<compile_context>
chip_gen: v7x
topology: tpu7x:2x2x1
jax: 0.10.0
libtpu: 0.0.40
codegen_flags: <defaults>
</compile_context>

<pallas_src>
import math
import functools

import jax
import jax.numpy as jnp
from jax.experimental import pallas as pl
from jax.experimental.pallas import tpu as pltpu


def _round_up(v, m):
    return (v + m - 1) // m * m


def detection_head_kernel(x_ref, w1_ref, w2_ref, w3_ref, vec_ref, b3_ref,
                          scale_ref, out_ref, *, c_pad, nc1, inv_c,
                          split_stage2):
    cp = c_pad

    # Packed bias/LN params (f32): rows = b1, g1, bt1, b2, g2, bt2, each laid
    # out as [cls (padded to C_pad) | box (padded to C_pad)].
    vec = vec_ref[...]
    b1, g1, bt1 = vec[0:1], vec[1:2], vec[2:3]
    b2, g2, bt2 = vec[3:4], vec[4:5], vec[5:6]

    def ln_relu(h, gamma, beta):
        # Padded lanes of h are exactly zero, so plain sums with the true-C
        # divisor give the correct mean / E[h^2]; gamma/beta are zero-padded,
        # so the LN output (and ReLU) stays exactly zero in padded lanes.
        mean = jnp.sum(h, axis=-1, keepdims=True) * inv_c
        ex2 = jnp.sum(h * h, axis=-1, keepdims=True) * inv_c
        var = ex2 - mean * mean
        y = (h - mean) * jax.lax.rsqrt(var + 1e-5) * gamma + beta
        return jnp.maximum(y, 0.0)

    x = x_ref[...]
    w1 = w1_ref[...]

    # Stage 1 (both subnets fused along N): (tm, C_pad) @ (C_pad, 2*C_pad).
    h = jnp.dot(x, w1, preferred_element_type=jnp.float32)
    hc = ln_relu(h[:, :cp] + b1[:, :cp], g1[:, :cp], bt1[:, :cp])
    hb = ln_relu(h[:, cp:] + b1[:, cp:], g1[:, cp:], bt1[:, cp:])

    # Stage 2.
    w2 = w2_ref[...]
    if split_stage2:
        # w2: (C_pad, 2*C_pad) = [W2_cls | W2_box]; two dense dots (no
        # block-diagonal zeros, no lane concat).
        h2c = jnp.dot(hc.astype(w2.dtype), w2[:, :cp],
                      preferred_element_type=jnp.float32) + b2[:, :cp]
        h2b = jnp.dot(hb.astype(w2.dtype), w2[:, cp:],
                      preferred_element_type=jnp.float32) + b2[:, cp:]
    else:
        # C_pad == 128: one fused block-diagonal (tm,256)@(256,256) dot fills
        # the 256x256 MXU better than two 128-wide dots.
        hcat = jnp.concatenate([hc, hb], axis=1).astype(w2.dtype)
        h2 = jnp.dot(hcat, w2, preferred_element_type=jnp.float32) + b2
        h2c, h2b = h2[:, :cp], h2[:, cp:]

    hc = ln_relu(h2c, g2[:, :cp], bt2[:, :cp])
    hb = ln_relu(h2b, g2[:, cp:], bt2[:, cp:])

    # Stage 3: lane-dense (tm, out_pad) output slab.
    # cols [0, nc1) = cls logits, cols [nc1, nc1+4) = box preds, rest zero.
    w3 = w3_ref[...]
    out = (jnp.dot(hc.astype(w3.dtype), w3[:cp],
                   preferred_element_type=jnp.float32)
           + jnp.dot(hb.astype(w3.dtype), w3[cp:],
                     preferred_element_type=jnp.float32)
           + b3_ref[...])

    scale = scale_ref[0, 0]  # exp(bbox_scale), pre-exponentiated in wrapper
    ocol = jax.lax.broadcasted_iota(jnp.int32, (1, out.shape[-1]), 1)
    box_mask = jnp.logical_and(ocol >= nc1, ocol < nc1 + 4)
    out = jnp.where(box_mask, jax.nn.sigmoid(out * scale), out)

    out_ref[...] = out.astype(out_ref.dtype)


def _pack_params(params, c, c_pad, nc1, out_pad, compute_dtype, split_stage2):
    """Pack the two subnets into fused, zero-padded weight blocks."""
    cls, box = params["cls"], params["box"]
    f32 = jnp.float32

    w1 = jnp.zeros((c_pad, 2 * c_pad), f32)
    w1 = w1.at[:c, :c].set(cls["w1"]).at[:c, c_pad:c_pad + c].set(box["w1"])

    if split_stage2:
        # Side-by-side dense blocks: cols [0,C_pad)=W2_cls, [C_pad,2C_pad)=W2_box.
        w2 = jnp.zeros((c_pad, 2 * c_pad), f32)
        w2 = w2.at[:c, :c].set(cls["w2"]).at[:c, c_pad:c_pad + c].set(box["w2"])
    else:
        # Block-diagonal fused weight (only used when C_pad == 128).
        w2 = jnp.zeros((2 * c_pad, 2 * c_pad), f32)
        w2 = (w2.at[:c, :c].set(cls["w2"])
                 .at[c_pad:c_pad + c, c_pad:c_pad + c].set(box["w2"]))

    w3 = jnp.zeros((2 * c_pad, out_pad), f32)
    w3 = (w3.at[:c, :nc1].set(cls["w3"])
             .at[c_pad:c_pad + c, nc1:nc1 + 4].set(box["w3"]))

    def row(cv, bv):
        r = jnp.zeros((1, 2 * c_pad), f32)
        return r.at[:, :c].set(cv).at[:, c_pad:c_pad + c].set(bv)

    vec = jnp.concatenate([
        row(cls["b1"], box["b1"]),
        row(cls["g1"], box["g1"]),
        row(cls["bt1"], box["bt1"]),
        row(cls["b2"], box["b2"]),
        row(cls["g2"], box["g2"]),
        row(cls["bt2"], box["bt2"]),
    ], axis=0)

    b3 = jnp.zeros((1, out_pad), f32)
    b3 = b3.at[:, :nc1].set(cls["b3"]).at[:, nc1:nc1 + 4].set(box["b3"])

    return (w1.astype(compute_dtype), w2.astype(compute_dtype),
            w3.astype(compute_dtype), vec, b3)


def detection_head_forward(x, params, *, tm=512, compute_dtype=jnp.bfloat16):
    """x: [B, Q, C]. Returns (class_logits [B,Q,nc+1], bbox_pred [B,Q,4])."""
    B, Q, C = x.shape
    nc1 = params["cls"]["b3"].shape[-1]

    c_pad = _round_up(C, 128)
    out_pad = _round_up(nc1 + 4, 128)
    split_stage2 = c_pad >= 256  # keep the fused block-diag dot at C_pad==128

    M = B * Q
    tm_eff = max(8, min(_round_up(tm, 8), _round_up(M, 8)))
    # Give the 'parallel' M axis at least two grid steps when possible so both
    # v7x TensorCores get work.
    if M > 8 and pl.cdiv(M, tm_eff) < 2:
        tm_eff = max(8, _round_up(pl.cdiv(M, 2), 8))
    m_pad = _round_up(M, tm_eff)

    x2d = x.reshape(M, C)
    if x2d.dtype != compute_dtype:
        x2d = x2d.astype(compute_dtype)
    if m_pad != M or c_pad != C:
        x2d = jnp.pad(x2d, ((0, m_pad - M), (0, c_pad - C)))

    w1, w2, w3, vec, b3 = _pack_params(params, C, c_pad, nc1, out_pad,
                                       compute_dtype, split_stage2)
    # exp() hoisted out of the kernel; passed via SMEM.
    scale = jnp.exp(params["bbox_scale"]).reshape(1, 1).astype(jnp.float32)

    kernel = functools.partial(detection_head_kernel, c_pad=c_pad, nc1=nc1,
                               inv_c=1.0 / float(C), split_stage2=split_stage2)

    # VMEM budget: weights (assume worst-case 2x buffering) + double-buffered
    # x/out tiles + f32 intermediates with slack.  Cap at 64 MiB (v7x physical).
    isz = jnp.dtype(compute_dtype).itemsize
    w_bytes = (w1.size + w2.size + w3.size) * isz + (vec.size + b3.size) * 4
    est = (2 * w_bytes + 2 * tm_eff * c_pad * isz + 2 * tm_eff * out_pad * 4
           + 10 * tm_eff * c_pad * 4 + (1 << 20))
    vmem_limit = int(min(64 * 2 ** 20, max(est, 32 * 2 ** 20)))

    def build(single_buffer_consts):
        def const_spec(a):
            kw = {}
            if single_buffer_consts and hasattr(pl, "Buffered"):
                # Constant-index blocks are never re-fetched: single-buffer them.
                kw["pipeline_mode"] = pl.Buffered(1)
            return pl.BlockSpec(a.shape, lambda i: (0,) * a.ndim, **kw)

        return pl.pallas_call(
            kernel,
            out_shape=jax.ShapeDtypeStruct((m_pad, out_pad), jnp.float32),
            grid_spec=pltpu.PrefetchScalarGridSpec(
                num_scalar_prefetch=0,
                grid=(m_pad // tm_eff,),
                in_specs=[
                    pl.BlockSpec((tm_eff, c_pad), lambda i: (i, 0)),   # x rows
                    const_spec(w1), const_spec(w2), const_spec(w3),
                    const_spec(vec), const_spec(b3),
                    pl.BlockSpec(memory_space=pltpu.MemorySpace.SMEM),  # scale
                ],
                out_specs=pl.BlockSpec((tm_eff, out_pad), lambda i: (i, 0)),
            ),
            compiler_params=pltpu.CompilerParams(
                dimension_semantics=("parallel",),
                vmem_limit_bytes=vmem_limit,
            ),
        )

    args = (x2d, w1, w2, w3, vec, b3, scale)
    try:
        out2d = build(True)(*args)
    except Exception:
        # Fallback if single-buffering via pipeline_mode is unsupported here.
        out2d = build(False)(*args)

    cls = out2d[:M, :nc1].reshape(B, Q, nc1)
    box = out2d[:M, nc1:nc1 + 4].reshape(B, Q, 4)
    return cls, box


# ----------------------------- reference & init -----------------------------

def _layernorm(h, gamma, beta, eps=1e-5):
    mean = jnp.mean(h, axis=-1, keepdims=True)
    var = jnp.mean((h - mean) ** 2, axis=-1, keepdims=True)
    return (h - mean) * jax.lax.rsqrt(var + eps) * gamma + beta


def reference_forward(x, params):
    def mlp(x, p):
        h = x @ p["w1"] + p["b1"]
        h = jnp.maximum(_layernorm(h, p["g1"], p["bt1"]), 0.0)
        h = h @ p["w2"] + p["b2"]
        h = jnp.maximum(_layernorm(h, p["g2"], p["bt2"]), 0.0)
        return h @ p["w3"] + p["b3"]

    cls = mlp(x, params["cls"])
    box = jax.nn.sigmoid(mlp(x, params["box"]) *
                         jnp.exp(params["bbox_scale"][0, 0]))
    return cls, box


def init_params(key, in_channels, num_classes):
    """Deterministic synthetic init mirroring the PyTorch module's shapes."""
    C = in_channels
    nc1 = num_classes + 1
    keys = jax.random.split(key, 6)

    def lin(k, fan_in, fan_out):
        bound = 1.0 / math.sqrt(fan_in)
        kw, kb = jax.random.split(k)
        w = jax.random.uniform(kw, (fan_in, fan_out), jnp.float32, -bound, bound)
        b = jax.random.uniform(kb, (1, fan_out), jnp.float32, -bound, bound)
        return w, b

    def subnet(ks, out_dim):
        w1, b1 = lin(ks[0], C, C)
        w2, b2 = lin(ks[1], C, C)
        w3, b3 = lin(ks[2], C, out_dim)
        return {
            "w1": w1, "b1": b1,
            "g1": jnp.ones((1, C), jnp.float32), "bt1": jnp.zeros((1, C), jnp.float32),
            "w2": w2, "b2": b2,
            "g2": jnp.ones((1, C), jnp.float32), "bt2": jnp.zeros((1, C), jnp.float32),
            "w3": w3, "b3": b3,
        }

    cls = subnet(keys[0:3], nc1)
    box = subnet(keys[3:6], 4)

    # class_subnet[-1].bias = -log((1 - p) / p), p = 0.01
    prior_prob = 0.01
    cls["b3"] = jnp.full((1, nc1), -math.log((1 - prior_prob) / prior_prob),
                         jnp.float32)

    bbox_scale = jnp.full((1, 1), 0.1, jnp.float32)  # nn.Parameter(ones(1)*0.1)
    return {"cls": cls, "box": box, "bbox_scale": bbox_scale}


if __name__ == "__main__":
    key = jax.random.PRNGKey(0)

    # --- small case (C_pad = 128, fused block-diag stage 2) -----------------
    B, Q, C, NUM_CLASSES = 2, 8, 32, 7
    kx, kp, kx2, kp2 = jax.random.split(key, 4)
    x = jax.random.normal(kx, (B, Q, C), jnp.float32)
    params = init_params(kp, C, NUM_CLASSES)
    cls_ref, box_ref = reference_forward(x, params)

    # f32 operands: tight tolerance.
    cls_f32, box_f32 = detection_head_forward(x, params,
                                              compute_dtype=jnp.float32)
    cls_f32 = jax.block_until_ready(cls_f32)
    box_f32 = jax.block_until_ready(box_f32)
    assert cls_f32.shape == (B, Q, NUM_CLASSES + 1)
    assert box_f32.shape == (B, Q, 4)
    assert jnp.allclose(cls_f32, cls_ref, atol=1e-4, rtol=1e-4)
    assert jnp.allclose(box_f32, box_ref, atol=1e-4, rtol=1e-4)

    # Default bf16 matmul-operand path: looser tolerance.
    cls_bf, box_bf = detection_head_forward(x, params)
    cls_bf = jax.block_until_ready(cls_bf)
    box_bf = jax.block_until_ready(box_bf)
    assert jnp.allclose(cls_bf, cls_ref, atol=1.5e-1, rtol=1e-1)
    assert jnp.allclose(box_bf, box_ref, atol=1.5e-1, rtol=1e-1)

    # --- wider case (C_pad = 256, split stage-2 path) -----------------------
    C2 = 256
    x2 = jax.random.normal(kx2, (B, Q, C2), jnp.float32)
    params2 = init_params(kp2, C2, NUM_CLASSES)
    cls2_ref, box2_ref = reference_forward(x2, params2)
    cls2, box2 = detection_head_forward(x2, params2, compute_dtype=jnp.float32)
    cls2 = jax.block_until_ready(cls2)
    box2 = jax.block_until_ready(box2)
    assert jnp.allclose(cls2, cls2_ref, atol=2e-3, rtol=2e-3)
    assert jnp.allclose(box2, box2_ref, atol=2e-3, rtol=2e-3)

    print("KERNEL_OK")
</pallas_src>

<mosaic_0001>
module attributes {stable_mosaic.version = 11 : i64} {
  func.func @detection_head_kernel(%arg0: i32, %arg1: memref<8x128xf32, #tpu.memory_space<vmem>>, %arg2: memref<128x256xf32, #tpu.memory_space<vmem>>, %arg3: memref<256x256xf32, #tpu.memory_space<vmem>>, %arg4: memref<256x128xf32, #tpu.memory_space<vmem>>, %arg5: memref<6x256xf32, #tpu.memory_space<vmem>>, %arg6: memref<1x128xf32, #tpu.memory_space<vmem>>, %arg7: memref<1x1xf32, #tpu.memory_space<smem>>, %arg8: memref<8x128xf32, #tpu.memory_space<vmem>>) attributes {dimension_semantics = [#tpu.dimension_semantics<parallel>], iteration_bounds = array<i64: 2>, scalar_prefetch = 0 : i64, scratch_operands = 0 : i64, tpu.core_type = #tpu.core_type<tc>, window_params = [{transform_indices = @transform_0, window_bounds = array<i64: 8, 128>}, {pipeline_mode = #tpu.pipeline_mode<synchronous>, transform_indices = @transform_1, window_bounds = array<i64: 128, 256>}, {pipeline_mode = #tpu.pipeline_mode<synchronous>, transform_indices = @transform_2, window_bounds = array<i64: 256, 256>}, {pipeline_mode = #tpu.pipeline_mode<synchronous>, transform_indices = @transform_3, window_bounds = array<i64: 256, 128>}, {pipeline_mode = #tpu.pipeline_mode<synchronous>, transform_indices = @transform_4, window_bounds = array<i64: 6, 256>}, {pipeline_mode = #tpu.pipeline_mode<synchronous>, transform_indices = @transform_5, window_bounds = array<i64: 1, 128>}, {transform_indices = @transform_6, window_bounds = array<i64: 1, 1>}, {transform_indices = @transform_7, window_bounds = array<i64: 8, 128>}]} {
    %c0 = arith.constant 0 : index
    %c0_0 = arith.constant 0 : index
    %0 = vector.load %arg5[%c0, %c0_0] : memref<6x256xf32, #tpu.memory_space<vmem>>, vector<6x256xf32>
    %1 = vector.extract_strided_slice %0 {offsets = [0, 0], sizes = [1, 256], strides = [1, 1]} : vector<6x256xf32> to vector<1x256xf32>
    %2 = vector.extract_strided_slice %0 {offsets = [1, 0], sizes = [1, 256], strides = [1, 1]} : vector<6x256xf32> to vector<1x256xf32>
    %3 = vector.extract_strided_slice %0 {offsets = [2, 0], sizes = [1, 256], strides = [1, 1]} : vector<6x256xf32> to vector<1x256xf32>
    %4 = vector.extract_strided_slice %0 {offsets = [3, 0], sizes = [1, 256], strides = [1, 1]} : vector<6x256xf32> to vector<1x256xf32>
    %5 = vector.extract_strided_slice %0 {offsets = [4, 0], sizes = [1, 256], strides = [1, 1]} : vector<6x256xf32> to vector<1x256xf32>
    %6 = vector.extract_strided_slice %0 {offsets = [5, 0], sizes = [1, 256], strides = [1, 1]} : vector<6x256xf32> to vector<1x256xf32>
    %c0_1 = arith.constant 0 : index
    %c0_2 = arith.constant 0 : index
    %7 = vector.load %arg1[%c0_1, %c0_2] : memref<8x128xf32, #tpu.memory_space<vmem>>, vector<8x128xf32>
    %c0_3 = arith.constant 0 : index
    %c0_4 = arith.constant 0 : index
    %8 = vector.load %arg2[%c0_3, %c0_4] : memref<128x256xf32, #tpu.memory_space<vmem>>, vector<128x256xf32>
    %cst = arith.constant dense<0.000000e+00> : vector<8x256xf32>
    %9 = tpu.matmul %7, %8, %cst {dimension_numbers = #tpu.dot_dimension_numbers<[1], [0], [0], [1], [0, 0, 1, 1], [], []>} : vector<8x128xf32>, vector<128x256xf32>, vector<8x256xf32> -> vector<8x256xf32>
    %10 = vector.extract_strided_slice %9 {offsets = [0, 0], sizes = [8, 128], strides = [1, 1]} : vector<8x256xf32> to vector<8x128xf32>
    %11 = vector.extract_strided_slice %1 {offsets = [0, 0], sizes = [1, 128], strides = [1, 1]} : vector<1x256xf32> to vector<1x128xf32>
    %12 = vector.broadcast %11 : vector<1x128xf32> to vector<8x128xf32>
    %13 = arith.addf %10, %12 : vector<8x128xf32>
    %14 = vector.extract_strided_slice %2 {offsets = [0, 0], sizes = [1, 128], strides = [1, 1]} : vector<1x256xf32> to vector<1x128xf32>
    %15 = vector.extract_strided_slice %3 {offsets = [0, 0], sizes = [1, 128], strides = [1, 1]} : vector<1x256xf32> to vector<1x128xf32>
    %cst_5 = arith.constant dense<0.000000e+00> : vector<8xf32>
    %16 = vector.multi_reduction <add>, %13, %cst_5 [1] : vector<8x128xf32> to vector<8xf32>
    %17 = vector.shape_cast %16 : vector<8xf32> to vector<8x1xf32>
    %cst_6 = arith.constant 3.125000e-02 : f32
    %18 = vector.broadcast %cst_6 : f32 to vector<8x1xf32>
    %19 = arith.mulf %17, %18 : vector<8x1xf32>
    %20 = arith.mulf %13, %13 : vector<8x128xf32>
    %cst_7 = arith.constant dense<0.000000e+00> : vector<8xf32>
    %21 = vector.multi_reduction <add>, %20, %cst_7 [1] : vector<8x128xf32> to vector<8xf32>
    %22 = vector.shape_cast %21 : vector<8xf32> to vector<8x1xf32>
    %cst_8 = arith.constant 3.125000e-02 : f32
    %23 = vector.broadcast %cst_8 : f32 to vector<8x1xf32>
    %24 = arith.mulf %22, %23 : vector<8x1xf32>
    %25 = arith.mulf %19, %19 : vector<8x1xf32>
    %26 = arith.subf %24, %25 : vector<8x1xf32>
    %27 = vector.broadcast %19 : vector<8x1xf32> to vector<8x128xf32>
    %28 = arith.subf %13, %27 : vector<8x128xf32>
    %cst_9 = arith.constant 9.99999974E-6 : f32
    %29 = vector.broadcast %cst_9 : f32 to vector<8x1xf32>
    %30 = arith.addf %26, %29 : vector<8x1xf32>
    %31 = math.rsqrt %30 : vector<8x1xf32>
    %32 = vector.broadcast %31 : vector<8x1xf32> to vector<8x128xf32>
    %33 = arith.mulf %28, %32 : vector<8x128xf32>
    %34 = vector.broadcast %14 : vector<1x128xf32> to vector<8x128xf32>
    %35 = arith.mulf %33, %34 : vector<8x128xf32>
    %36 = vector.broadcast %15 : vector<1x128xf32> to vector<8x128xf32>
    %37 = arith.addf %35, %36 : vector<8x128xf32>
    %cst_10 = arith.constant 0.000000e+00 : f32
    %38 = vector.broadcast %cst_10 : f32 to vector<8x128xf32>
    %39 = arith.maximumf %37, %38 : vector<8x128xf32>
    %40 = vector.extract_strided_slice %9 {offsets = [0, 128], sizes = [8, 128], strides = [1, 1]} : vector<8x256xf32> to vector<8x128xf32>
    %41 = vector.extract_strided_slice %1 {offsets = [0, 128], sizes = [1, 128], strides = [1, 1]} : vector<1x256xf32> to vector<1x128xf32>
    %42 = vector.broadcast %41 : vector<1x128xf32> to vector<8x128xf32>
    %43 = arith.addf %40, %42 : vector<8x128xf32>
    %44 = vector.extract_strided_slice %2 {offsets = [0, 128], sizes = [1, 128], strides = [1, 1]} : vector<1x256xf32> to vector<1x128xf32>
    %45 = vector.extract_strided_slice %3 {offsets = [0, 128], sizes = [1, 128], strides = [1, 1]} : vector<1x256xf32> to vector<1x128xf32>
    %cst_11 = arith.constant dense<0.000000e+00> : vector<8xf32>
    %46 = vector.multi_reduction <add>, %43, %cst_11 [1] : vector<8x128xf32> to vector<8xf32>
    %47 = vector.shape_cast %46 : vector<8xf32> to vector<8x1xf32>
    %cst_12 = arith.constant 3.125000e-02 : f32
    %48 = vector.broadcast %cst_12 : f32 to vector<8x1xf32>
    %49 = arith.mulf %47, %48 : vector<8x1xf32>
    %50 = arith.mulf %43, %43 : vector<8x128xf32>
    %cst_13 = arith.constant dense<0.000000e+00> : vector<8xf32>
    %51 = vector.multi_reduction <add>, %50, %cst_13 [1] : vector<8x128xf32> to vector<8xf32>
    %52 = vector.shape_cast %51 : vector<8xf32> to vector<8x1xf32>
    %cst_14 = arith.constant 3.125000e-02 : f32
    %53 = vector.broadcast %cst_14 : f32 to vector<8x1xf32>
    %54 = arith.mulf %52, %53 : vector<8x1xf32>
    %55 = arith.mulf %49, %49 : vector<8x1xf32>
    %56 = arith.subf %54, %55 : vector<8x1xf32>
    %57 = vector.broadcast %49 : vector<8x1xf32> to vector<8x128xf32>
    %58 = arith.subf %43, %57 : vector<8x128xf32>
    %cst_15 = arith.constant 9.99999974E-6 : f32
    %59 = vector.broadcast %cst_15 : f32 to vector<8x1xf32>
    %60 = arith.addf %56, %59 : vector<8x1xf32>
    %61 = math.rsqrt %60 : vector<8x1xf32>
    %62 = vector.broadcast %61 : vector<8x1xf32> to vector<8x128xf32>
    %63 = arith.mulf %58, %62 : vector<8x128xf32>
    %64 = vector.broadcast %44 : vector<1x128xf32> to vector<8x128xf32>
    %65 = arith.mulf %63, %64 : vector<8x128xf32>
    %66 = vector.broadcast %45 : vector<1x128xf32> to vector<8x128xf32>
    %67 = arith.addf %65, %66 : vector<8x128xf32>
    %cst_16 = arith.constant 0.000000e+00 : f32
    %68 = vector.broadcast %cst_16 : f32 to vector<8x128xf32>
    %69 = arith.maximumf %67, %68 : vector<8x128xf32>
    %c0_17 = arith.constant 0 : index
    %c0_18 = arith.constant 0 : index
    %70 = vector.load %arg3[%c0_17, %c0_18] : memref<256x256xf32, #tpu.memory_space<vmem>>, vector<256x256xf32>
    %71 = tpu.concatenate %39, %69 in 1 : vector<8x128xf32>, vector<8x128xf32> -> vector<8x256xf32>
    %cst_19 = arith.constant dense<0.000000e+00> : vector<8x256xf32>
    %72 = tpu.matmul %71, %70, %cst_19 {dimension_numbers = #tpu.dot_dimension_numbers<[1], [0], [0], [1], [0, 0, 1, 1], [], []>} : vector<8x256xf32>, vector<256x256xf32>, vector<8x256xf32> -> vector<8x256xf32>
    %73 = vector.broadcast %4 : vector<1x256xf32> to vector<8x256xf32>
    %74 = arith.addf %72, %73 : vector<8x256xf32>
    %75 = vector.extract_strided_slice %74 {offsets = [0, 0], sizes = [8, 128], strides = [1, 1]} : vector<8x256xf32> to vector<8x128xf32>
    %76 = vector.extract_strided_slice %74 {offsets = [0, 128], sizes = [8, 128], strides = [1, 1]} : vector<8x256xf32> to vector<8x128xf32>
    %77 = vector.extract_strided_slice %5 {offsets = [0, 0], sizes = [1, 128], strides = [1, 1]} : vector<1x256xf32> to vector<1x128xf32>
    %78 = vector.extract_strided_slice %6 {offsets = [0, 0], sizes = [1, 128], strides = [1, 1]} : vector<1x256xf32> to vector<1x128xf32>
    %cst_20 = arith.constant dense<0.000000e+00> : vector<8xf32>
    %79 = vector.multi_reduction <add>, %75, %cst_20 [1] : vector<8x128xf32> to vector<8xf32>
    %80 = vector.shape_cast %79 : vector<8xf32> to vector<8x1xf32>
    %cst_21 = arith.constant 3.125000e-02 : f32
    %81 = vector.broadcast %cst_21 : f32 to vector<8x1xf32>
    %82 = arith.mulf %80, %81 : vector<8x1xf32>
    %83 = arith.mulf %75, %75 : vector<8x128xf32>
    %cst_22 = arith.constant dense<0.000000e+00> : vector<8xf32>
    %84 = vector.multi_reduction <add>, %83, %cst_22 [1] : vector<8x128xf32> to vector<8xf32>
    %85 = vector.shape_cast %84 : vector<8xf32> to vector<8x1xf32>
    %cst_23 = arith.constant 3.125000e-02 : f32
    %86 = vector.broadcast %cst_23 : f32 to vector<8x1xf32>
    %87 = arith.mulf %85, %86 : vector<8x1xf32>
    %88 = arith.mulf %82, %82 : vector<8x1xf32>
    %89 = arith.subf %87, %88 : vector<8x1xf32>
    %90 = vector.broadcast %82 : vector<8x1xf32> to vector<8x128xf32>
    %91 = arith.subf %75, %90 : vector<8x128xf32>
    %cst_24 = arith.constant 9.99999974E-6 : f32
    %92 = vector.broadcast %cst_24 : f32 to vector<8x1xf32>
    %93 = arith.addf %89, %92 : vector<8x1xf32>
    %94 = math.rsqrt %93 : vector<8x1xf32>
    %95 = vector.broadcast %94 : vector<8x1xf32> to vector<8x128xf32>
    %96 = arith.mulf %91, %95 : vector<8x128xf32>
    %97 = vector.broadcast %77 : vector<1x128xf32> to vector<8x128xf32>
    %98 = arith.mulf %96, %97 : vector<8x128xf32>
    %99 = vector.broadcast %78 : vector<1x128xf32> to vector<8x128xf32>
    %100 = arith.addf %98, %99 : vector<8x128xf32>
    %cst_25 = arith.constant 0.000000e+00 : f32
    %101 = vector.broadcast %cst_25 : f32 to vector<8x128xf32>
    %102 = arith.maximumf %100, %101 : vector<8x128xf32>
    %103 = vector.extract_strided_slice %5 {offsets = [0, 128], sizes = [1, 128], strides = [1, 1]} : vector<1x256xf32> to vector<1x128xf32>
    %104 = vector.extract_strided_slice %6 {offsets = [0, 128], sizes = [1, 128], strides = [1, 1]} : vector<1x256xf32> to vector<1x128xf32>
    %cst_26 = arith.constant dense<0.000000e+00> : vector<8xf32>
    %105 = vector.multi_reduction <add>, %76, %cst_26 [1] : vector<8x128xf32> to vector<8xf32>
    %106 = vector.shape_cast %105 : vector<8xf32> to vector<8x1xf32>
    %cst_27 = arith.constant 3.125000e-02 : f32
    %107 = vector.broadcast %cst_27 : f32 to vector<8x1xf32>
    %108 = arith.mulf %106, %107 : vector<8x1xf32>
    %109 = arith.mulf %76, %76 : vector<8x128xf32>
    %cst_28 = arith.constant dense<0.000000e+00> : vector<8xf32>
    %110 = vector.multi_reduction <add>, %109, %cst_28 [1] : vector<8x128xf32> to vector<8xf32>
    %111 = vector.shape_cast %110 : vector<8xf32> to vector<8x1xf32>
    %cst_29 = arith.constant 3.125000e-02 : f32
    %112 = vector.broadcast %cst_29 : f32 to vector<8x1xf32>
    %113 = arith.mulf %111, %112 : vector<8x1xf32>
    %114 = arith.mulf %108, %108 : vector<8x1xf32>
    %115 = arith.subf %113, %114 : vector<8x1xf32>
    %116 = vector.broadcast %108 : vector<8x1xf32> to vector<8x128xf32>
    %117 = arith.subf %76, %116 : vector<8x128xf32>
    %cst_30 = arith.constant 9.99999974E-6 : f32
    %118 = vector.broadcast %cst_30 : f32 to vector<8x1xf32>
    %119 = arith.addf %115, %118 : vector<8x1xf32>
    %120 = math.rsqrt %119 : vector<8x1xf32>
    %121 = vector.broadcast %120 : vector<8x1xf32> to vector<8x128xf32>
    %122 = arith.mulf %117, %121 : vector<8x128xf32>
    %123 = vector.broadcast %103 : vector<1x128xf32> to vector<8x128xf32>
    %124 = arith.mulf %122, %123 : vector<8x128xf32>
    %125 = vector.broadcast %104 : vector<1x128xf32> to vector<8x128xf32>
    %126 = arith.addf %124, %125 : vector<8x128xf32>
    %cst_31 = arith.constant 0.000000e+00 : f32
    %127 = vector.broadcast %cst_31 : f32 to vector<8x128xf32>
    %128 = arith.maximumf %126, %127 : vector<8x128xf32>
    %c0_32 = arith.constant 0 : index
    %c0_33 = arith.constant 0 : index
    %129 = vector.load %arg4[%c0_32, %c0_33] : memref<256x128xf32, #tpu.memory_space<vmem>>, vector<256x128xf32>
    %130 = vector.extract_strided_slice %129 {offsets = [0, 0], sizes = [128, 128], strides = [1, 1]} : vector<256x128xf32> to vector<128x128xf32>
    %cst_34 = arith.constant dense<0.000000e+00> : vector<8x128xf32>
    %131 = tpu.matmul %102, %130, %cst_34 {dimension_numbers = #tpu.dot_dimension_numbers<[1], [0], [0], [1], [0, 0, 1, 1], [], []>} : vector<8x128xf32>, vector<128x128xf32>, vector<8x128xf32> -> vector<8x128xf32>
    %132 = vector.extract_strided_slice %129 {offsets = [128, 0], sizes = [128, 128], strides = [1, 1]} : vector<256x128xf32> to vector<128x128xf32>
    %cst_35 = arith.constant dense<0.000000e+00> : vector<8x128xf32>
    %133 = tpu.matmul %128, %132, %cst_35 {dimension_numbers = #tpu.dot_dimension_numbers<[1], [0], [0], [1], [0, 0, 1, 1], [], []>} : vector<8x128xf32>, vector<128x128xf32>, vector<8x128xf32> -> vector<8x128xf32>
    %134 = arith.addf %131, %133 : vector<8x128xf32>
    %c0_36 = arith.constant 0 : index
    %c0_37 = arith.constant 0 : index
    %135 = vector.load %arg6[%c0_36, %c0_37] : memref<1x128xf32, #tpu.memory_space<vmem>>, vector<1x128xf32>
    %136 = vector.broadcast %135 : vector<1x128xf32> to vector<8x128xf32>
    %137 = arith.addf %134, %136 : vector<8x128xf32>
    %c0_38 = arith.constant 0 : index
    %c0_39 = arith.constant 0 : index
    %138 = memref.load %arg7[%c0_38, %c0_39] : memref<1x1xf32, #tpu.memory_space<smem>>
    %139 = tpu.iota {dimensions = array<i32: 1>} : vector<1x128xi32>
    %c8_i32 = arith.constant 8 : i32
    %140 = vector.broadcast %c8_i32 : i32 to vector<1x128xi32>
    %141 = arith.cmpi sge, %139, %140 : vector<1x128xi32>
    %c12_i32 = arith.constant 12 : i32
    %142 = vector.broadcast %c12_i32 : i32 to vector<1x128xi32>
    %143 = arith.cmpi slt, %139, %142 : vector<1x128xi32>
    %144 = arith.andi %141, %143 : vector<1x128xi1>
    %145 = vector.broadcast %138 : f32 to vector<8x128xf32>
    %146 = arith.mulf %137, %145 : vector<8x128xf32>
    %147 = arith.negf %146 : vector<8x128xf32>
    %148 = math.exp %147 : vector<8x128xf32>
    %cst_40 = arith.constant 1.000000e+00 : f32
    %149 = vector.broadcast %cst_40 : f32 to vector<8x128xf32>
    %150 = arith.addf %149, %148 : vector<8x128xf32>
    %151 = arith.divf %149, %150 : vector<8x128xf32>
    %152 = vector.shape_cast %144 : vector<1x128xi1> to vector<1x128xi1>
    %153 = vector.broadcast %152 : vector<1x128xi1> to vector<8x128xi1>
    %154 = arith.select %153, %151, %137 : vector<8x128xi1>, vector<8x128xf32>
    %c0_41 = arith.constant 0 : index
    %c0_42 = arith.constant 0 : index
    %155 = vector.load %arg8[%c0_41, %c0_42] : memref<8x128xf32, #tpu.memory_space<vmem>>, vector<8x128xf32>
    tpu.vector_store %arg8[%c0_41, %c0_42], %154 {strides = array<i32>} : memref<8x128xf32, #tpu.memory_space<vmem>>, vector<8x128xf32>,
    return
  }
  func.func @transform_0(%arg0: i32) -> (i32, i32) {
    %c0_i32 = arith.constant 0 : i32
    %c0_i32_0 = arith.constant 0 : i32
    return %arg0, %c0_i32 : i32, i32
  }
  func.func @transform_1(%arg0: i32) -> (i32, i32) {
    %c0_i32 = arith.constant 0 : i32
    %c0_i32_0 = arith.constant 0 : i32
    %c0_i32_1 = arith.constant 0 : i32
    return %c0_i32, %c0_i32_0 : i32, i32
  }
  func.func @transform_2(%arg0: i32) -> (i32, i32) {
    %c0_i32 = arith.constant 0 : i32
    %c0_i32_0 = arith.constant 0 : i32
    %c0_i32_1 = arith.constant 0 : i32
    return %c0_i32, %c0_i32_0 : i32, i32
  }
  func.func @transform_3(%arg0: i32) -> (i32, i32) {
    %c0_i32 = arith.constant 0 : i32
    %c0_i32_0 = arith.constant 0 : i32
    %c0_i32_1 = arith.constant 0 : i32
    return %c0_i32, %c0_i32_0 : i32, i32
  }
  func.func @transform_4(%arg0: i32) -> (i32, i32) {
    %c0_i32 = arith.constant 0 : i32
    %c0_i32_0 = arith.constant 0 : i32
    %c0_i32_1 = arith.constant 0 : i32
    return %c0_i32, %c0_i32_0 : i32, i32
  }
  func.func @transform_5(%arg0: i32) -> (i32, i32) {
    %c0_i32 = arith.constant 0 : i32
    %c0_i32_0 = arith.constant 0 : i32
    %c0_i32_1 = arith.constant 0 : i32
    return %c0_i32, %c0_i32_0 : i32, i32
  }
  func.func @transform_6(%arg0: i32) -> (i32, i32) {
    %c0_i32 = arith.constant 0 : i32
    %c0_i32_0 = arith.constant 0 : i32
    %c0_i32_1 = arith.constant 0 : i32
    return %c0_i32, %c0_i32_0 : i32, i32
  }
  func.func @transform_7(%arg0: i32) -> (i32, i32) {
    %c0_i32 = arith.constant 0 : i32
    %c0_i32_0 = arith.constant 0 : i32
    return %arg0, %c0_i32 : i32, i32
  }
}

module attributes {stable_mosaic.version = 11 : i64} {
  func.func @detection_head_kernel(%arg0: i32, %arg1: memref<8x128xf32, #tpu.memory_space<vmem>>, %arg2: memref<128x256xf32, #tpu.memory_space<vmem>>, %arg3: memref<256x256xf32, #tpu.memory_space<vmem>>, %arg4: memref<256x128xf32, #tpu.memory_space<vmem>>, %arg5: memref<6x256xf32, #tpu.memory_space<vmem>>, %arg6: memref<1x128xf32, #tpu.memory_space<vmem>>, %arg7: memref<1x1xf32, #tpu.memory_space<smem>>, %arg8: memref<8x128xf32, #tpu.memory_space<vmem>>) attributes {dimension_semantics = [#tpu.dimension_semantics<parallel>], iteration_bounds = array<i64: 2>, scalar_prefetch = 0 : i64, scratch_operands = 0 : i64, tpu.core_type = #tpu.core_type<tc>, window_params = [{transform_indices = @transform_0, window_bounds = array<i64: 8, 128>}, {pipeline_mode = #tpu.pipeline_mode<synchronous>, transform_indices = @transform_1, window_bounds = array<i64: 128, 256>}, {pipeline_mode = #tpu.pipeline_mode<synchronous>, transform_indices = @transform_2, window_bounds = array<i64: 256, 256>}, {pipeline_mode = #tpu.pipeline_mode<synchronous>, transform_indices = @transform_3, window_bounds = array<i64: 256, 128>}, {pipeline_mode = #tpu.pipeline_mode<synchronous>, transform_indices = @transform_4, window_bounds = array<i64: 6, 256>}, {pipeline_mode = #tpu.pipeline_mode<synchronous>, transform_indices = @transform_5, window_bounds = array<i64: 1, 128>}, {transform_indices = @transform_6, window_bounds = array<i64: 1, 1>}, {transform_indices = @transform_7, window_bounds = array<i64: 8, 128>}]} {
    %c0 = arith.constant 0 : index
    %c0_0 = arith.constant 0 : index
    %0 = vector.load %arg5[%c0, %c0_0] : memref<6x256xf32, #tpu.memory_space<vmem>>, vector<6x256xf32>
    %1 = vector.extract_strided_slice %0 {offsets = [0, 0], sizes = [1, 256], strides = [1, 1]} : vector<6x256xf32> to vector<1x256xf32>
    %2 = vector.extract_strided_slice %0 {offsets = [1, 0], sizes = [1, 256], strides = [1, 1]} : vector<6x256xf32> to vector<1x256xf32>
    %3 = vector.extract_strided_slice %0 {offsets = [2, 0], sizes = [1, 256], strides = [1, 1]} : vector<6x256xf32> to vector<1x256xf32>
    %4 = vector.extract_strided_slice %0 {offsets = [3, 0], sizes = [1, 256], strides = [1, 1]} : vector<6x256xf32> to vector<1x256xf32>
    %5 = vector.extract_strided_slice %0 {offsets = [4, 0], sizes = [1, 256], strides = [1, 1]} : vector<6x256xf32> to vector<1x256xf32>
    %6 = vector.extract_strided_slice %0 {offsets = [5, 0], sizes = [1, 256], strides = [1, 1]} : vector<6x256xf32> to vector<1x256xf32>
    %c0_1 = arith.constant 0 : index
    %c0_2 = arith.constant 0 : index
    %7 = vector.load %arg1[%c0_1, %c0_2] : memref<8x128xf32, #tpu.memory_space<vmem>>, vector<8x128xf32>
    %c0_3 = arith.constant 0 : index
    %c0_4 = arith.constant 0 : index
    %8 = vector.load %arg2[%c0_3, %c0_4] : memref<128x256xf32, #tpu.memory_space<vmem>>, vector<128x256xf32>
    %cst = arith.constant dense<0.000000e+00> : vector<8x256xf32>
    %9 = tpu.matmul %7, %8, %cst {dimension_numbers = #tpu.dot_dimension_numbers<[1], [0], [0], [1], [0, 0, 1, 1], [], []>} : vector<8x128xf32>, vector<128x256xf32>, vector<8x256xf32> -> vector<8x256xf32>
    %10 = vector.extract_strided_slice %9 {offsets = [0, 0], sizes = [8, 128], strides = [1, 1]} : vector<8x256xf32> to vector<8x128xf32>
    %11 = vector.extract_strided_slice %1 {offsets = [0, 0], sizes = [1, 128], strides = [1, 1]} : vector<1x256xf32> to vector<1x128xf32>
    %12 = vector.broadcast %11 : vector<1x128xf32> to vector<8x128xf32>
    %13 = arith.addf %10, %12 : vector<8x128xf32>
    %14 = vector.extract_strided_slice %2 {offsets = [0, 0], sizes = [1, 128], strides = [1, 1]} : vector<1x256xf32> to vector<1x128xf32>
    %15 = vector.extract_strided_slice %3 {offsets = [0, 0], sizes = [1, 128], strides = [1, 1]} : vector<1x256xf32> to vector<1x128xf32>
    %cst_5 = arith.constant dense<0.000000e+00> : vector<8xf32>
    %16 = vector.multi_reduction <add>, %13, %cst_5 [1] : vector<8x128xf32> to vector<8xf32>
    %17 = vector.shape_cast %16 : vector<8xf32> to vector<8x1xf32>
    %cst_6 = arith.constant 3.125000e-02 : f32
    %18 = vector.broadcast %cst_6 : f32 to vector<8x1xf32>
    %19 = arith.mulf %17, %18 : vector<8x1xf32>
    %20 = arith.mulf %13, %13 : vector<8x128xf32>
    %cst_7 = arith.constant dense<0.000000e+00> : vector<8xf32>
    %21 = vector.multi_reduction <add>, %20, %cst_7 [1] : vector<8x128xf32> to vector<8xf32>
    %22 = vector.shape_cast %21 : vector<8xf32> to vector<8x1xf32>
    %cst_8 = arith.constant 3.125000e-02 : f32
    %23 = vector.broadcast %cst_8 : f32 to vector<8x1xf32>
    %24 = arith.mulf %22, %23 : vector<8x1xf32>
    %25 = arith.mulf %19, %19 : vector<8x1xf32>
    %26 = arith.subf %24, %25 : vector<8x1xf32>
    %27 = vector.broadcast %19 : vector<8x1xf32> to vector<8x128xf32>
    %28 = arith.subf %13, %27 : vector<8x128xf32>
    %cst_9 = arith.constant 9.99999974E-6 : f32
    %29 = vector.broadcast %cst_9 : f32 to vector<8x1xf32>
    %30 = arith.addf %26, %29 : vector<8x1xf32>
    %31 = math.rsqrt %30 : vector<8x1xf32>
    %32 = vector.broadcast %31 : vector<8x1xf32> to vector<8x128xf32>
    %33 = arith.mulf %28, %32 : vector<8x128xf32>
    %34 = vector.broadcast %14 : vector<1x128xf32> to vector<8x128xf32>
    %35 = arith.mulf %33, %34 : vector<8x128xf32>
    %36 = vector.broadcast %15 : vector<1x128xf32> to vector<8x128xf32>
    %37 = arith.addf %35, %36 : vector<8x128xf32>
    %cst_10 = arith.constant 0.000000e+00 : f32
    %38 = vector.broadcast %cst_10 : f32 to vector<8x128xf32>
    %39 = arith.maximumf %37, %38 : vector<8x128xf32>
    %40 = vector.extract_strided_slice %9 {offsets = [0, 128], sizes = [8, 128], strides = [1, 1]} : vector<8x256xf32> to vector<8x128xf32>
    %41 = vector.extract_strided_slice %1 {offsets = [0, 128], sizes = [1, 128], strides = [1, 1]} : vector<1x256xf32> to vector<1x128xf32>
    %42 = vector.broadcast %41 : vector<1x128xf32> to vector<8x128xf32>
    %43 = arith.addf %40, %42 : vector<8x128xf32>
    %44 = vector.extract_strided_slice %2 {offsets = [0, 128], sizes = [1, 128], strides = [1, 1]} : vector<1x256xf32> to vector<1x128xf32>
    %45 = vector.extract_strided_slice %3 {offsets = [0, 128], sizes = [1, 128], strides = [1, 1]} : vector<1x256xf32> to vector<1x128xf32>
    %cst_11 = arith.constant dense<0.000000e+00> : vector<8xf32>
    %46 = vector.multi_reduction <add>, %43, %cst_11 [1] : vector<8x128xf32> to vector<8xf32>
    %47 = vector.shape_cast %46 : vector<8xf32> to vector<8x1xf32>
    %cst_12 = arith.constant 3.125000e-02 : f32
    %48 = vector.broadcast %cst_12 : f32 to vector<8x1xf32>
    %49 = arith.mulf %47, %48 : vector<8x1xf32>
    %50 = arith.mulf %43, %43 : vector<8x128xf32>
    %cst_13 = arith.constant dense<0.000000e+00> : vector<8xf32>
    %51 = vector.multi_reduction <add>, %50, %cst_13 [1] : vector<8x128xf32> to vector<8xf32>
    %52 = vector.shape_cast %51 : vector<8xf32> to vector<8x1xf32>
    %cst_14 = arith.constant 3.125000e-02 : f32
    %53 = vector.broadcast %cst_14 : f32 to vector<8x1xf32>
    %54 = arith.mulf %52, %53 : vector<8x1xf32>
    %55 = arith.mulf %49, %49 : vector<8x1xf32>
    %56 = arith.subf %54, %55 : vector<8x1xf32>
    %57 = vector.broadcast %49 : vector<8x1xf32> to vector<8x128xf32>
    %58 = arith.subf %43, %57 : vector<8x128xf32>
    %cst_15 = arith.constant 9.99999974E-6 : f32
    %59 = vector.broadcast %cst_15 : f32 to vector<8x1xf32>
    %60 = arith.addf %56, %59 : vector<8x1xf32>
    %61 = math.rsqrt %60 : vector<8x1xf32>
    %62 = vector.broadcast %61 : vector<8x1xf32> to vector<8x128xf32>
    %63 = arith.mulf %58, %62 : vector<8x128xf32>
    %64 = vector.broadcast %44 : vector<1x128xf32> to vector<8x128xf32>
    %65 = arith.mulf %63, %64 : vector<8x128xf32>
    %66 = vector.broadcast %45 : vector<1x128xf32> to vector<8x128xf32>
    %67 = arith.addf %65, %66 : vector<8x128xf32>
    %cst_16 = arith.constant 0.000000e+00 : f32
    %68 = vector.broadcast %cst_16 : f32 to vector<8x128xf32>
    %69 = arith.maximumf %67, %68 : vector<8x128xf32>
    %c0_17 = arith.constant 0 : index
    %c0_18 = arith.constant 0 : index
    %70 = vector.load %arg3[%c0_17, %c0_18] : memref<256x256xf32, #tpu.memory_space<vmem>>, vector<256x256xf32>
    %71 = tpu.concatenate %39, %69 in 1 : vector<8x128xf32>, vector<8x128xf32> -> vector<8x256xf32>
    %cst_19 = arith.constant dense<0.000000e+00> : vector<8x256xf32>
    %72 = tpu.matmul %71, %70, %cst_19 {dimension_numbers = #tpu.dot_dimension_numbers<[1], [0], [0], [1], [0, 0, 1, 1], [], []>} : vector<8x256xf32>, vector<256x256xf32>, vector<8x256xf32> -> vector<8x256xf32>
    %73 = vector.broadcast %4 : vector<1x256xf32> to vector<8x256xf32>
    %74 = arith.addf %72, %73 : vector<8x256xf32>
    %75 = vector.extract_strided_slice %74 {offsets = [0, 0], sizes = [8, 128], strides = [1, 1]} : vector<8x256xf32> to vector<8x128xf32>
    %76 = vector.extract_strided_slice %74 {offsets = [0, 128], sizes = [8, 128], strides = [1, 1]} : vector<8x256xf32> to vector<8x128xf32>
    %77 = vector.extract_strided_slice %5 {offsets = [0, 0], sizes = [1, 128], strides = [1, 1]} : vector<1x256xf32> to vector<1x128xf32>
    %78 = vector.extract_strided_slice %6 {offsets = [0, 0], sizes = [1, 128], strides = [1, 1]} : vector<1x256xf32> to vector<1x128xf32>
    %cst_20 = arith.constant dense<0.000000e+00> : vector<8xf32>
    %79 = vector.multi_reduction <add>, %75, %cst_20 [1] : vector<8x128xf32> to vector<8xf32>
    %80 = vector.shape_cast %79 : vector<8xf32> to vector<8x1xf32>
    %cst_21 = arith.constant 3.125000e-02 : f32
    %81 = vector.broadcast %cst_21 : f32 to vector<8x1xf32>
    %82 = arith.mulf %80, %81 : vector<8x1xf32>
    %83 = arith.mulf %75, %75 : vector<8x128xf32>
    %cst_22 = arith.constant dense<0.000000e+00> : vector<8xf32>
    %84 = vector.multi_reduction <add>, %83, %cst_22 [1] : vector<8x128xf32> to vector<8xf32>
    %85 = vector.shape_cast %84 : vector<8xf32> to vector<8x1xf32>
    %cst_23 = arith.constant 3.125000e-02 : f32
    %86 = vector.broadcast %cst_23 : f32 to vector<8x1xf32>
    %87 = arith.mulf %85, %86 : vector<8x1xf32>
    %88 = arith.mulf %82, %82 : vector<8x1xf32>
    %89 = arith.subf %87, %88 : vector<8x1xf32>
    %90 = vector.broadcast %82 : vector<8x1xf32> to vector<8x128xf32>
    %91 = arith.subf %75, %90 : vector<8x128xf32>
    %cst_24 = arith.constant 9.99999974E-6 : f32
    %92 = vector.broadcast %cst_24 : f32 to vector<8x1xf32>
    %93 = arith.addf %89, %92 : vector<8x1xf32>
    %94 = math.rsqrt %93 : vector<8x1xf32>
    %95 = vector.broadcast %94 : vector<8x1xf32> to vector<8x128xf32>
    %96 = arith.mulf %91, %95 : vector<8x128xf32>
    %97 = vector.broadcast %77 : vector<1x128xf32> to vector<8x128xf32>
    %98 = arith.mulf %96, %97 : vector<8x128xf32>
    %99 = vector.broadcast %78 : vector<1x128xf32> to vector<8x128xf32>
    %100 = arith.addf %98, %99 : vector<8x128xf32>
    %cst_25 = arith.constant 0.000000e+00 : f32
    %101 = vector.broadcast %cst_25 : f32 to vector<8x128xf32>
    %102 = arith.maximumf %100, %101 : vector<8x128xf32>
    %103 = vector.extract_strided_slice %5 {offsets = [0, 128], sizes = [1, 128], strides = [1, 1]} : vector<1x256xf32> to vector<1x128xf32>
    %104 = vector.extract_strided_slice %6 {offsets = [0, 128], sizes = [1, 128], strides = [1, 1]} : vector<1x256xf32> to vector<1x128xf32>
    %cst_26 = arith.constant dense<0.000000e+00> : vector<8xf32>
    %105 = vector.multi_reduction <add>, %76, %cst_26 [1] : vector<8x128xf32> to vector<8xf32>
    %106 = vector.shape_cast %105 : vector<8xf32> to vector<8x1xf32>
    %cst_27 = arith.constant 3.125000e-02 : f32
    %107 = vector.broadcast %cst_27 : f32 to vector<8x1xf32>
    %108 = arith.mulf %106, %107 : vector<8x1xf32>
    %109 = arith.mulf %76, %76 : vector<8x128xf32>
    %cst_28 = arith.constant dense<0.000000e+00> : vector<8xf32>
    %110 = vector.multi_reduction <add>, %109, %cst_28 [1] : vector<8x128xf32> to vector<8xf32>
    %111 = vector.shape_cast %110 : vector<8xf32> to vector<8x1xf32>
    %cst_29 = arith.constant 3.125000e-02 : f32
    %112 = vector.broadcast %cst_29 : f32 to vector<8x1xf32>
    %113 = arith.mulf %111, %112 : vector<8x1xf32>
    %114 = arith.mulf %108, %108 : vector<8x1xf32>
    %115 = arith.subf %113, %114 : vector<8x1xf32>
    %116 = vector.broadcast %108 : vector<8x1xf32> to vector<8x128xf32>
    %117 = arith.subf %76, %116 : vector<8x128xf32>
    %cst_30 = arith.constant 9.99999974E-6 : f32
    %118 = vector.broadcast %cst_30 : f32 to vector<8x1xf32>
    %119 = arith.addf %115, %118 : vector<8x1xf32>
    %120 = math.rsqrt %119 : vector<8x1xf32>
    %121 = vector.broadcast %120 : vector<8x1xf32> to vector<8x128xf32>
    %122 = arith.mulf %117, %121 : vector<8x128xf32>
    %123 = vector.broadcast %103 : vector<1x128xf32> to vector<8x128xf32>
    %124 = arith.mulf %122, %123 : vector<8x128xf32>
    %125 = vector.broadcast %104 : vector<1x128xf32> to vector<8x128xf32>
    %126 = arith.addf %124, %125 : vector<8x128xf32>
    %cst_31 = arith.constant 0.000000e+00 : f32
    %127 = vector.broadcast %cst_31 : f32 to vector<8x128xf32>
    %128 = arith.maximumf %126, %127 : vector<8x128xf32>
    %c0_32 = arith.constant 0 : index
    %c0_33 = arith.constant 0 : index
    %129 = vector.load %arg4[%c0_32, %c0_33] : memref<256x128xf32, #tpu.memory_space<vmem>>, vector<256x128xf32>
    %130 = vector.extract_strided_slice %129 {offsets = [0, 0], sizes = [128, 128], strides = [1, 1]} : vector<256x128xf32> to vector<128x128xf32>
    %cst_34 = arith.constant dense<0.000000e+00> : vector<8x128xf32>
    %131 = tpu.matmul %102, %130, %cst_34 {dimension_numbers = #tpu.dot_dimension_numbers<[1], [0], [0], [1], [0, 0, 1, 1], [], []>} : vector<8x128xf32>, vector<128x128xf32>, vector<8x128xf32> -> vector<8x128xf32>
    %132 = vector.extract_strided_slice %129 {offsets = [128, 0], sizes = [128, 128], strides = [1, 1]} : vector<256x128xf32> to vector<128x128xf32>
    %cst_35 = arith.constant dense<0.000000e+00> : vector<8x128xf32>
    %133 = tpu.matmul %128, %132, %cst_35 {dimension_numbers = #tpu.dot_dimension_numbers<[1], [0], [0], [1], [0, 0, 1, 1], [], []>} : vector<8x128xf32>, vector<128x128xf32>, vector<8x128xf32> -> vector<8x128xf32>
    %134 = arith.addf %131, %133 : vector<8x128xf32>
    %c0_36 = arith.constant 0 : index
    %c0_37 = arith.constant 0 : index
    %135 = vector.load %arg6[%c0_36, %c0_37] : memref<1x128xf32, #tpu.memory_space<vmem>>, vector<1x128xf32>
    %136 = vector.broadcast %135 : vector<1x128xf32> to vector<8x128xf32>
    %137 = arith.addf %134, %136 : vector<8x128xf32>
    %c0_38 = arith.constant 0 : index
    %c0_39 = arith.constant 0 : index
    %138 = memref.load %arg7[%c0_38, %c0_39] : memref<1x1xf32, #tpu.memory_space<smem>>
    %139 = tpu.iota {dimensions = array<i32: 1>} : vector<1x128xi32>
    %c8_i32 = arith.constant 8 : i32
    %140 = vector.broadcast %c8_i32 : i32 to vector<1x128xi32>
    %141 = arith.cmpi sge, %139, %140 : vector<1x128xi32>
    %c12_i32 = arith.constant 12 : i32
    %142 = vector.broadcast %c12_i32 : i32 to vector<1x128xi32>
    %143 = arith.cmpi slt, %139, %142 : vector<1x128xi32>
    %144 = arith.andi %141, %143 : vector<1x128xi1>
    %145 = vector.broadcast %138 : f32 to vector<8x128xf32>
    %146 = arith.mulf %137, %145 : vector<8x128xf32>
    %147 = arith.negf %146 : vector<8x128xf32>
    %148 = math.exp %147 : vector<8x128xf32>
    %cst_40 = arith.constant 1.000000e+00 : f32
    %149 = vector.broadcast %cst_40 : f32 to vector<8x128xf32>
    %150 = arith.addf %149, %148 : vector<8x128xf32>
    %151 = arith.divf %149, %150 : vector<8x128xf32>
    %152 = vector.shape_cast %144 : vector<1x128xi1> to vector<1x128xi1>
    %153 = vector.broadcast %152 : vector<1x128xi1> to vector<8x128xi1>
    %154 = arith.select %153, %151, %137 : vector<8x128xi1>, vector<8x128xf32>
    %c0_41 = arith.constant 0 : index
    %c0_42 = arith.constant 0 : index
    %155 = vector.load %arg8[%c0_41, %c0_42] : memref<8x128xf32, #tpu.memory_space<vmem>>, vector<8x128xf32>
    tpu.vector_store %arg8[%c0_41, %c0_42], %154 {strides = array<i32>} : memref<8x128xf32, #tpu.memory_space<vmem>>, vector<8x128xf32>,
    return
  }
  func.func @transform_0(%arg0: i32) -> (i32, i32) {
    %c0_i32 = arith.constant 0 : i32
    %c0_i32_0 = arith.constant 0 : i32
    return %arg0, %c0_i32 : i32, i32
  }
  func.func @transform_1(%arg0: i32) -> (i32, i32) {
    %c0_i32 = arith.constant 0 : i32
    %c0_i32_0 = arith.constant 0 : i32
    %c0_i32_1 = arith.constant 0 : i32
    return %c0_i32, %c0_i32_0 : i32, i32
  }
  func.func @transform_2(%arg0: i32) -> (i32, i32) {
    %c0_i32 = arith.constant 0 : i32
    %c0_i32_0 = arith.constant 0 : i32
    %c0_i32_1 = arith.constant 0 : i32
    return %c0_i32, %c0_i32_0 : i32, i32
  }
  func.func @transform_3(%arg0: i32) -> (i32, i32) {
    %c0_i32 = arith.constant 0 : i32
    %c0_i32_0 = arith.constant 0 : i32
    %c0_i32_1 = arith.constant 0 : i32
    return %c0_i32, %c0_i32_0 : i32, i32
  }
  func.func @transform_4(%arg0: i32) -> (i32, i32) {
    %c0_i32 = arith.constant 0 : i32
    %c0_i32_0 = arith.constant 0 : i32
    %c0_i32_1 = arith.constant 0 : i32
    return %c0_i32, %c0_i32_0 : i32, i32
  }
  func.func @transform_5(%arg0: i32) -> (i32, i32) {
    %c0_i32 = arith.constant 0 : i32
    %c0_i32_0 = arith.constant 0 : i32
    %c0_i32_1 = arith.constant 0 : i32
    return %c0_i32, %c0_i32_0 : i32, i32
  }
  func.func @transform_6(%arg0: i32) -> (i32, i32) {
    %c0_i32 = arith.constant 0 : i32
    %c0_i32_0 = arith.constant 0 : i32
    %c0_i32_1 = arith.constant 0 : i32
    return %c0_i32, %c0_i32_0 : i32, i32
  }
  func.func @transform_7(%arg0: i32) -> (i32, i32) {
    %c0_i32 = arith.constant 0 : i32
    %c0_i32_0 = arith.constant 0 : i32
    return %arg0, %c0_i32 : i32, i32
  }
}

</mosaic_0001>

<bundles_post_ra>
// kernel: tpu_custom_call.1
= control target key start
LH: loop header
LB: loop body
LE: loop exit
PB: predicated region body
PF: predicated region fallthrough
CT: control target
= control target key end

     0   :  { %s1949_s0 = inlined_call_operand.hbm [shape: f32[16,128], index: 0, kind: input, shape index: {}]   ;;  %s1950_s1 = inlined_call_operand.hbm [shape: f32[128,256], index: 1, kind: input, shape index: {}]   ;;  %s1951_s2 = inlined_call_operand.hbm [shape: f32[256,256], index: 2, kind: input, shape index: {}]   ;;  %s1952_s3 = inlined_call_operand.hbm [shape: f32[256,128], index: 3, kind: input, shape index: {}]   ;;  %s1953_s4 = inlined_call_operand.vmem [shape: f32[6,256], index: 4, kind: input, shape index: {}]   ;;  %s1954_s5 = inlined_call_operand.vmem [shape: f32[1,128], index: 5, kind: input, shape index: {}]   ;;  %s1955_s6 = inlined_call_operand.<no memory space> [shape: f32[1,1], index: 6, kind: input, shape index: {}]   ;;  %s1956_s7 = inlined_call_operand.hbm [shape: f32[16,128], index: 7, kind: output, shape index: {}]  }
   0x1   :  { %12 = sst [smem:[#allocation2]] %s1955_s6 }
   0x2   :  { %13 = vsyncpa [#allocation4], 0 }
   0x3   :  { %15 = vsyncpa [#allocation4 + $0x1], 0 }
   0x4   :  { %16 = vsyncpa [#allocation7], 0 }
   0x5   :  { %17 = vsyncpa [#allocation10], 0 }
   0x6   :  { %18 = vsyncpa [#allocation5], 0 }
   0x7   :  { %20 = vsyncpa [#allocation5 + $0x1], 0  ;;  %s1614_s26 = smov 0   ;;  %s1616_s27 = smov 0  }
   0x8   :  { %s1618_s28 = smov 0   ;;  %s1620_s29 = smov 0  }
   0x9 LB: > { %s1635_s6 = sadd.s32 4294967295, %s1557_s29   ;;  %s1005_s30 = sadd.s32 4294967294, %s1557_s29   ;;  %s1557_s29 = sphi %s1620_s29, %s1979_s29   ;;  %s1553_s28 = sphi %s1618_s28, %s1978_s28   ;;  %s1549_s27 = sphi %s1616_s27, %s1977_s27   ;;  %s1545_s26 = sphi %s1614_s26, %s1976_s26  }
   0xa   : > { %p46_p0 = scmp.ne.s32.totalorder %s1549_s27, %s1545_s26  ;;  %p1957_p1 = scmp.eq.s32.totalorder %s1635_s6, 0 }
   0xb   : > { %p202_p3 = scmp.eq.s32.totalorder %s1005_s30, 1  ;;  %p1006_p5 = scmp.ge.s32.totalorder %s1557_s29, 1 }
   0xc   : > { %p1644_p4 = por %p1957_p1, %p46_p0  ;;  %p209_p7 = scmp.lt.s32.totalorder %s1557_s29, 3 }
   0xd   : > { %p1649_p6 = por %p202_p3, %p46_p0  ;;  %s1559_s11 = smov [#allocation6]  }
   0xe   : > { %s1960_s8 = scalar_select %p1644_p4, 1, 0 }
   0xf   : > { %s1961_s9 = scalar_select %p1649_p6, 1, 0 }
  0x10   : > { %p1654_p8 = pnand %p1006_p5, %p209_p7  ;;  %s221_s12 = sshll.u32 %s1559_s11, 4  ;;  %s1658_s12 = int_to_ptr.vmem [resolvable:$true] %s221_s12 }
  0x11   : > { %s1560_s14 = smov [#allocation8]   ;;  %s1561_s16 = smov [#allocation9]  }
  0x12   : > { %s1962_s10 = scalar_select %p1654_p8, 1, 0 }
  0x13   : > { %p1289_p9 = pneg %p1654_p8  ;;  %s234_s15 = sshll.u32 %s1560_s14, 4  ;;  %s1669_s15 = int_to_ptr.vmem [resolvable:$true] %s234_s15 }
  0x14   : > { %s1671_s17 = sshll.u32 %s1561_s16, 4  ;;  %s1369_s20 = scalar_lea.hbm %s1950_s1, 4096  ;;  %s248_s17 = int_to_ptr.vmem [resolvable:$true] %s1671_s17 }
  0x15   : > { %p1665_p11 = pnand %p1289_p9, %p1957_p1  ;;  %p1370_p12 = scmp.ne.s32.totalorder %s1950_s1, %s1369_s20 }
  0x16   : > { %p1376_p5 = scmp.lt.u32.totalorder %s1369_s20, %s1950_s1 }
  0x17   : > { %p1681_p13 = pneg %p1665_p11 }
  0x19   : > { %p1372_p0 = pnand %p1681_p13, %p1370_p12 }
  0x1b   : > { %p1373_p3 = pneg %p1372_p0 }
  0x1d   : > { %p1378_p7 = pnand %p1376_p5, %p1373_p3 }
  0x1f   : > { %1381 = shalt.err (!%p1378_p7)
}
  0x20   : > { %s1382_s30 = scalar_lea.vmem %s1658_s12, 4096  ;;  %p1390_p2 = scmp.lt.s32.totalorder %s1658_s12, %s1658_s12 }
  0x21   : > { %p1383_p9 = scmp.ne.s32.totalorder %s1658_s12, %s1382_s30  ;;  %p1391_p6 = scmp.lt.s32.totalorder %s1382_s30, %s1382_s30 }
  0x23   : > { %p1385_p10 = pnand %p1383_p9, %p1681_p13  ;;  %p1392_p12 = por %p1391_p6, %p1390_p2 }
  0x25   : > { %p1386_p1 = pneg %p1385_p10 }
  0x27   : > { %p1393_p0 = pnand %p1392_p12, %p1386_p1 }
  0x29   : > { %1396 = shalt.err (!%p1393_p0)
}
  0x2a   : > { %s1562_s11 = smov 256   ;;  %s1563_s14 = smov 16  }
  0x2b   : > { %1292 = dma.hbm_to_vmem [thread:$0]  (!%p1665_p11), %s1950_s1, 4096, %s1658_s12, [#allocation7], %s1562_s11, %s1562_s11, %s1563_s14  }
  0x2c   : > { %s1397_s21 = scalar_lea.hbm %s1951_s2, 8192 }
  0x2d   : > { %p1398_p2 = scmp.ne.s32.totalorder %s1951_s2, %s1397_s21  ;;  %p1404_p10 = scmp.lt.u32.totalorder %s1397_s21, %s1951_s2 }
  0x2f   : > { %p1400_p1 = pnand %p1398_p2, %p1681_p13 }
  0x31   : > { %p1401_p6 = pneg %p1400_p1 }
  0x33   : > { %p1406_p3 = pnand %p1404_p10, %p1401_p6 }
  0x35   : > { %1409 = shalt.err (!%p1406_p3)
}
  0x36   : > { %s1410_s12 = scalar_lea.vmem %s1669_s15, 8192  ;;  %p1418_p12 = scmp.lt.s32.totalorder %s1669_s15, %s1669_s15 }
  0x37   : > { %p1411_p5 = scmp.ne.s32.totalorder %s1669_s15, %s1410_s12  ;;  %p1419_p0 = scmp.lt.s32.totalorder %s1410_s12, %s1410_s12 }
  0x39   : > { %p1413_p7 = pnand %p1411_p5, %p1681_p13  ;;  %p1420_p2 = por %p1419_p0, %p1418_p12 }
  0x3b   : > { %p1414_p9 = pneg %p1413_p7 }
  0x3d   : > { %p1421_p1 = pnand %p1420_p2, %p1414_p9 }
  0x3f   : > { %1424 = shalt.err (!%p1421_p1)
}
  0x40   : > { %1295 = dma.hbm_to_vmem [thread:$0]  (!%p1665_p11), %s1951_s2, 8192, %s1669_s15, [#allocation7], %s1562_s11, %s1562_s11, %s1563_s14  }
  0x41   : > { %s1425_s21 = scalar_lea.hbm %s1952_s3, 4096 }
  0x42   : > { %p1426_p6 = scmp.ne.s32.totalorder %s1952_s3, %s1425_s21  ;;  %p1432_p5 = scmp.lt.u32.totalorder %s1425_s21, %s1952_s3 }
  0x44   : > { %p1428_p10 = pnand %p1426_p6, %p1681_p13 }
  0x46   : > { %p1429_p3 = pneg %p1428_p10 }
  0x48   : > { %p1434_p7 = pnand %p1432_p5, %p1429_p3 }
  0x4a   : > { %1437 = shalt.err (!%p1434_p7)
}
  0x4b   : > { %s1438_s12 = scalar_lea.vmem %s248_s17, 4096  ;;  %p1446_p2 = scmp.lt.s32.totalorder %s248_s17, %s248_s17 }
  0x4c   : > { %p1439_p9 = scmp.ne.s32.totalorder %s248_s17, %s1438_s12  ;;  %p1447_p1 = scmp.lt.s32.totalorder %s1438_s12, %s1438_s12 }
  0x4e   : > { %p1441_p12 = pnand %p1439_p9, %p1681_p13  ;;  %p1448_p4 = por %p1447_p1, %p1446_p2 }
  0x50   : > { %p1442_p0 = pneg %p1441_p12 }
  0x52   : > { %p1449_p8 = pnand %p1448_p4, %p1442_p0 }
  0x54   : > { %1452 = shalt.err (!%p1449_p8)
}
  0x55   : > { %s1564_s15 = smov 128   ;;  %s1565_s23 = smov 8  }
  0x56   : > { %1298 = dma.hbm_to_vmem [thread:$0]  (!%p1665_p11), %s1952_s3, 4096, %s248_s17, [#allocation10], %s1564_s15, %s1564_s15, %s1565_s23  }
  0x57   : > { %s1745_s16 = sadd.s32 1, %s1557_s29   ;;  %s33_s19 = sadd.s32 1, %s1553_s28 }
  0x58   : > { %s30_s18 = ssub.s32 %s1557_s29, %s1745_s16  ;;  %p40_p8 = scmp.ne.s32.totalorder %s1553_s28, %s1549_s27 }
  0x59   : > { %p31_p4 = scmp.eq.s32.totalorder %s30_s18, 0  ;;  %p41_p13 = scmp.eq.s32.totalorder %s1557_s29, 0 }
  0x5a   : > { %p1310_p6 = scmp.lt.s32.totalorder %s1557_s29, 2  ;;  %p1965_p3 = scmp.eq.s32.totalorder %s1635_s6, 1 }
  0x5b   : > { %s1755_s20 = scalar_select %p31_p4, %s1553_s28, %s33_s19  }
  0x5c   : > { %p42_p10 = por %p41_p13, %p40_p8  ;;  %p1759_p5 = por %p1965_p3, %p40_p8 }
  0x5d   : > { %s270_s13 = sand.u32 1, %s1553_s28   ;;  %s1012_s22 = sshll.u32 %s1557_s29, 7 }
  0x5e   : > { %s1011_s17 = sshll.u32 %s270_s13, 3  ;;  %s1768_s30 = scalar_lea.hbm %s1949_s0, %s1012_s22 }
  0x5f   : > { %s274_s12 = scalar_lea.vmem [#allocation3], %s1011_s17  ;;  %p1770_p11 = pnand %p1310_p6, %p42_p10 }
  0x60   : > { %s281_s15 = sshll.u32 %s274_s12, 4  ;;  %s271_s11 = scalar_lea.sflag [#allocation4], %s270_s13  ;;  %s1774_s15 = int_to_ptr.vmem [resolvable:$true] %s281_s15 }
  0x61   : > { %s1453_s14 = scalar_lea.hbm %s1768_s30, 128  ;;  %p1455_p9 = pneg %p1770_p11 }
  0x62   : > { %p1454_p7 = scmp.ne.s32.totalorder %s1768_s30, %s1453_s14  ;;  %s1458_s22 = scalar_lea.hbm %s1949_s0, 256 }
  0x63   : > { %p1459_p2 = scmp.lt.u32.totalorder %s1768_s30, %s1949_s0  ;;  %p1460_p1 = scmp.lt.u32.totalorder %s1458_s22, %s1453_s14 }
  0x64   : > { %p1456_p12 = pnand %p1455_p9, %p1454_p7  ;;  %p1462_p8 = scmp.lt.u32.totalorder %s1453_s14, %s1768_s30 }
  0x65   : > { %p1461_p4 = por %p1460_p1, %p1459_p2 }
  0x66   : > { %p1457_p0 = pneg %p1456_p12 }
  0x67   : > { %p1463_p13 = por %p1462_p8, %p1461_p4 }
  0x69   : > { %p1464_p6 = pnand %p1463_p13, %p1457_p0 }
  0x6b   : > { %1467 = shalt.err (!%p1464_p6)
}
  0x6c   : > { %s1468_s13 = scalar_lea.vmem %s1774_s15, 128  ;;  %s1566_s25 = smov [#allocation3]  }
  0x6d   : > { %p1469_p10 = scmp.ne.s32.totalorder %s1774_s15, %s1468_s13  ;;  %s1473_s12 = sshll.u32 %s1566_s25, 4  ;;  %s1474_s12 = int_to_ptr.vmem [resolvable:$false] %s1473_s12 }
  0x6e   : > { %s1475_s18 = scalar_lea.vmem %s1474_s12, 256  ;;  %p1476_p12 = scmp.lt.s32.totalorder %s1774_s15, %s1474_s12 }
  0x6f   : > { %p1471_p3 = pnand %p1469_p10, %p1455_p9  ;;  %p1477_p2 = scmp.lt.s32.totalorder %s1475_s18, %s1468_s13 }
  0x71   : > { %p1472_p7 = pneg %p1471_p3  ;;  %p1478_p1 = por %p1477_p2, %p1476_p12 }
  0x73   : > { %p1479_p4 = pnand %p1478_p1, %p1472_p7 }
  0x75   : > { %1482 = shalt.err (!%p1479_p4)
}
  0x76   : > { %1302 = dma.hbm_to_vmem [thread:$0]  (!%p1770_p11), %s1768_s30, 128, %s1774_s15, %s271_s11  }
  0x77   : > { %p1968_p0 = scmp.ne.s32.totalorder %s1962_s10, 0 }
  0x78   : > { %s1804_s14 = sand.u32 (!%p1968_p0), 1, %s1549_s27   ;;  %p1969_p9 = scmp.ne.s32.totalorder (!%p1968_p0), %s1960_s8, 0 }
  0x79   : > { %290 = sbr.rel (%p1968_p0) target bundleno = 1234 (0x4d2), region = 48  ;;  %s1014_s19 = sshll.u32 (!%p1968_p0), %s1804_s14, 3 }
  0x7a   : > { %s293_s22 = scalar_lea.sflag (!%p1968_p0), [#allocation4], %s1804_s14  ;;  %s1810_s17 = scalar_lea.vmem (!%p1968_p0), [#allocation3], %s1014_s19 }
  0x80   : > { %1528 = dma.done.wait (%p1969_p9), %s293_s22, 128  }
  0x81   : > { %1530 = vsyncadd (%p1969_p9), %s293_s22, 4294967168  ;;  %p1970_p11 = scmp.eq.s32.totalorder %s1635_s6, 0 }
  0x83   : > { %1532 = dma.done.wait (%p1970_p11), [#allocation7], 12288   ;;  %p1971_p8 = pmov %p1970_p11 }
  0x85   : > { %1534 = vsyncadd (%p1971_p8), [#allocation7], 4294955008  ;;  %p1972_p13 = pmov %p1971_p8 }
  0x86   : > { %p1973_p6 = pmov %p1971_p8 }
  0x87   : > { %1536 = dma.done.wait (%p1972_p13), [#allocation10], 4096  }
  0x88   : > { %1538 = vsyncadd (%p1973_p6), [#allocation10], 4294963200  ;;  %v1567_v0 = vmov 0.0   ;;  %v343_v1 = vld [vmem:[#allocation6 + $0x8] sm:$0xff]  ;;  %v345_v2 = vld [vmem:[#allocation6 + $0x18] sm:$0xff]  ;;  %vm1569_vm0 = vmmov 0  }
  0x89   : > { %438 = vmatprep.mubr.f32.mxu0 %v1567_v0  ;;  %v342_v3 = vld [vmem:[#allocation6] sm:$0xff]  ;;  %v1129_v4 = vpack.c.bf16 %v345_v2, %v343_v1  ;;  %v344_v5 = vld [vmem:[#allocation6 + $0x10] sm:$0xff]  ;;  %v347_v6 = vld [vmem:[#allocation6 + $0x28] sm:$0xff]  ;;  %s874_s23 = sld [smem:[#allocation2]]  ;;  %s1022_s13 = sshll.u32 %s1635_s6, 7 }
  0x8a   : > { %v349_v7 = vld [vmem:[#allocation6 + $0x38] sm:$0xff]  ;;  %v1131_v8 = vpack.c.bf16 %v344_v5, %v342_v3  ;;  %v346_v10 = vld [vmem:[#allocation6 + $0x20] sm:$0xff]  ;;  %v348_v11 = vld [vmem:[#allocation6 + $0x30] sm:$0xff]  ;;  %s338_s25 = scalar_lea.vmem [#allocation11], %s1014_s19  ;;  %s893_s8 = scalar_lea.sflag [#allocation5], %s1804_s14 }
  0x8b   : > { %v1133_v9 = vpack.c.bf16 %v349_v7, %v347_v6  ;;  %v351_v12 = vld [vmem:[#allocation6 + $0x48] sm:$0xff]  ;;  %1130 = vmatprep.subr.bf16.mxu0 %v1129_v4  ;;  %v353_v13 = vld [vmem:[#allocation6 + $0x58] sm:$0xff]  ;;  %v1135_v14 = vpack.c.bf16 %v348_v11, %v346_v10  ;;  %v350_v16 = vld [vmem:[#allocation6 + $0x40] sm:$0xff]  ;;  %s906_s12 = sshll.u32 %s338_s25, 4  ;;  %s1570_s6 = smov [#allocation11]   ;;  %s1907_s12 = int_to_ptr.vmem [resolvable:$true] %s906_s12 }
  0x8c   : > { %1132 = vmatpush1.bf16.msra.mxu0 %v1131_v8  ;;  %v1137_v15 = vpack.c.bf16 %v353_v13, %v351_v12  ;;  %v352_v17 = vld [vmem:[#allocation6 + $0x50] sm:$0xff]  ;;  %v355_v18 = vld [vmem:[#allocation6 + $0x68] sm:$0xff]  ;;  %v357_v19 = vld [vmem:[#allocation6 + $0x78] sm:$0xff]  ;;  %s1483_s10 = scalar_lea.vmem %s1907_s12, 128  ;;  %s1487_s19 = sshll.u32 %s1570_s6, 4  ;;  %s1488_s19 = int_to_ptr.vmem [resolvable:$false] %s1487_s19 }
  0x8d   : > { %1134 = vmatprep.subr.bf16.mxu0 %v1133_v9  ;;  %v1139_v20 = vpack.c.bf16 %v352_v17, %v350_v16  ;;  %v1141_v21 = vpack.c.bf16 %v357_v19, %v355_v18  ;;  %v354_v22 = vld [vmem:[#allocation6 + $0x60] sm:$0xff]  ;;  %v356_v23 = vld [vmem:[#allocation6 + $0x70] sm:$0xff]  ;;  %v359_v24 = vld [vmem:[#allocation6 + $0x88] sm:$0xff]  ;;  %p1484_p10 = scmp.ne.s32.totalorder %s1907_s12, %s1483_s10  ;;  %s1489_s30 = scalar_lea.vmem %s1488_s19, 256 }
  0x8e   : > { %v361_v25 = vld [vmem:[#allocation6 + $0x98] sm:$0xff]  ;;  %v1143_v26 = vpack.c.bf16 %v356_v23, %v354_v22  ;;  %v358_v28 = vld [vmem:[#allocation6 + $0x80] sm:$0xff]  ;;  %v360_v29 = vld [vmem:[#allocation6 + $0x90] sm:$0xff]  ;;  %p1490_p12 = scmp.lt.s32.totalorder %s1907_s12, %s1488_s19  ;;  %p1491_p2 = scmp.lt.s32.totalorder %s1489_s30, %s1483_s10 }
  0x8f   : > { %v1145_v27 = vpack.c.bf16 %v361_v25, %v359_v24  ;;  %v363_v30 = vld [vmem:[#allocation6 + $0xa8] sm:$0xff]  ;;  %v365_v31 = vld [vmem:[#allocation6 + $0xb8] sm:$0xff]  ;;  %v1147_v32 = vpack.c.bf16 %v360_v29, %v358_v28  ;;  %v362_v34 = vld [vmem:[#allocation6 + $0xa0] sm:$0xff]  ;;  %p1485_p3 = pnand %p1484_p10, %p1759_p5 }
  0x90   : > { %1136 = vmatpush1.bf16.msra.mxu0 %v1135_v14  ;;  %v1149_v33 = vpack.c.bf16 %v365_v31, %v363_v30  ;;  %v364_v35 = vld [vmem:[#allocation6 + $0xb0] sm:$0xff]  ;;  %v367_v36 = vld [vmem:[#allocation6 + $0xc8] sm:$0xff]  ;;  %v369_v37 = vld [vmem:[#allocation6 + $0xd8] sm:$0xff]  ;;  %p1492_p1 = por %p1491_p2, %p1490_p12 }
  0x91   : > { %1138 = vmatprep.subr.bf16.mxu0 %v1137_v15  ;;  %v1151_v38 = vpack.c.bf16 %v364_v35, %v362_v34  ;;  %v1153_v39 = vpack.c.bf16 %v369_v37, %v367_v36  ;;  %v366_v40 = vld [vmem:[#allocation6 + $0xc0] sm:$0xff]  ;;  %v368_v41 = vld [vmem:[#allocation6 + $0xd0] sm:$0xff]  ;;  %v371_v42 = vld [vmem:[#allocation6 + $0xe8] sm:$0xff]  ;;  %p1486_p7 = pneg %p1485_p3 }
  0x92   : > { %v373_v43 = vld [vmem:[#allocation6 + $0xf8] sm:$0xff]  ;;  %v1155_v44 = vpack.c.bf16 %v368_v41, %v366_v40  ;;  %v370_v46 = vld [vmem:[#allocation6 + $0xe0] sm:$0xff]  ;;  %v372_v47 = vld [vmem:[#allocation6 + $0xf0] sm:$0xff] }
  0x93   : > { %v1157_v45 = vpack.c.bf16 %v373_v43, %v371_v42  ;;  %v1159_v48 = vpack.c.bf16 %v372_v47, %v370_v46  ;;  %v341_v49 = vld [vmem:[%s1810_s17] sm:$0xff]  ;;  %v504_v50 = vld [vmem:[#allocation8 + $0x8] sm:$0xff]  ;;  %v503_v52 = vld [vmem:[#allocation8] sm:$0xff]  ;;  %s1905_s17 = scalar_lea.hbm %s1956_s7, %s1022_s13  ;;  %p1493_p4 = pnand %p1492_p1, %p1486_p7 }
  0x94   : > { %1140 = vmatpush1.bf16.msra.mxu0 %v1139_v20  ;;  %v506_v51 = vld [vmem:[#allocation8 + $0x18] sm:$0xff]  ;;  %v505_v54 = vld [vmem:[#allocation8 + $0x10] sm:$0xff]  ;;  %v508_v55 = vld [vmem:[#allocation8 + $0x28] sm:$0xff] }
  0x95   : > { %1142 = vmatprep.subr.bf16.mxu0 %v1141_v21  ;;  %v1161_v53 = vpack.c.bf16 %v506_v51, %v504_v50  ;;  %v510_v56 = vld [vmem:[#allocation8 + $0x38] sm:$0xff]  ;;  %v1163_v57 = vpack.c.bf16 %v505_v54, %v503_v52  ;;  %v507_v59 = vld [vmem:[#allocation8 + $0x20] sm:$0xff]  ;;  %v509_v60 = vld [vmem:[#allocation8 + $0x30] sm:$0xff] }
  0x96   : > { %v1165_v58 = vpack.c.bf16 %v510_v56, %v508_v55  ;;  %v512_v61 = vld [vmem:[#allocation8 + $0x48] sm:$0xff]  ;;  %v514_v62 = vld [vmem:[#allocation8 + $0x58] sm:$0xff]  ;;  %v1167_v63 = vpack.c.bf16 %v509_v60, %v507_v59  ;;  %v511_v2 = vld [vmem:[#allocation8 + $0x40] sm:$0xff] }
  0x97   : > { %1162 = vmatprep.subr.bf16.mxu1 %v1161_v53  ;;  %v1169_v1 = vpack.c.bf16 %v514_v62, %v512_v61  ;;  %v513_v3 = vld [vmem:[#allocation8 + $0x50] sm:$0xff]  ;;  %v516_v4 = vld [vmem:[#allocation8 + $0x68] sm:$0xff]  ;;  %v518_v5 = vld [vmem:[#allocation8 + $0x78] sm:$0xff] }
  0x98   : > { %1144 = vmatpush1.bf16.msra.mxu0 %v1143_v26  ;;  %1164 = vmatpush1.bf16.msra.mxu1 %v1163_v57  ;;  %v1171_v6 = vpack.c.bf16 %v513_v3, %v511_v2  ;;  %v1173_v7 = vpack.c.bf16 %v518_v5, %v516_v4  ;;  %v515_v8 = vld [vmem:[#allocation8 + $0x60] sm:$0xff]  ;;  %v517_v9 = vld [vmem:[#allocation8 + $0x70] sm:$0xff]  ;;  %v520_v10 = vld [vmem:[#allocation8 + $0x88] sm:$0xff] }
  0x99   : > { %1146 = vmatprep.subr.bf16.mxu0 %v1145_v27  ;;  %1166 = vmatprep.subr.bf16.mxu1 %v1165_v58  ;;  %v522_v11 = vld [vmem:[#allocation8 + $0x98] sm:$0xff]  ;;  %v1175_v12 = vpack.c.bf16 %v517_v9, %v515_v8  ;;  %v519_v14 = vld [vmem:[#allocation8 + $0x80] sm:$0xff]  ;;  %v521_v15 = vld [vmem:[#allocation8 + $0x90] sm:$0xff] }
  0x9a   : > { %v1177_v13 = vpack.c.bf16 %v522_v11, %v520_v10  ;;  %v524_v16 = vld [vmem:[#allocation8 + $0xa8] sm:$0xff]  ;;  %v526_v17 = vld [vmem:[#allocation8 + $0xb8] sm:$0xff]  ;;  %v1179_v18 = vpack.c.bf16 %v521_v15, %v519_v14  ;;  %v523_v20 = vld [vmem:[#allocation8 + $0xa0] sm:$0xff] }
  0x9b   : > { %v1181_v19 = vpack.c.bf16 %v526_v17, %v524_v16  ;;  %v525_v21 = vld [vmem:[#allocation8 + $0xb0] sm:$0xff]  ;;  %v528_v22 = vld [vmem:[#allocation8 + $0xc8] sm:$0xff]  ;;  %v530_v23 = vld [vmem:[#allocation8 + $0xd8] sm:$0xff] }
  0x9c   : > { %1148 = vmatpush1.bf16.msra.mxu0 %v1147_v32  ;;  %1168 = vmatpush1.bf16.msra.mxu1 %v1167_v63  ;;  %v1183_v24 = vpack.c.bf16 %v525_v21, %v523_v20  ;;  %v1185_v25 = vpack.c.bf16 %v530_v23, %v528_v22  ;;  %v527_v26 = vld [vmem:[#allocation8 + $0xc0] sm:$0xff]  ;;  %v529_v27 = vld [vmem:[#allocation8 + $0xd0] sm:$0xff]  ;;  %v532_v28 = vld [vmem:[#allocation8 + $0xe8] sm:$0xff] }
  0x9d   : > { %1150 = vmatprep.subr.bf16.mxu0 %v1149_v33  ;;  %1170 = vmatprep.subr.bf16.mxu1 %v1169_v1  ;;  %v534_v29 = vld [vmem:[#allocation8 + $0xf8] sm:$0xff]  ;;  %v1187_v30 = vpack.c.bf16 %v529_v27, %v527_v26  ;;  %v531_v32 = vld [vmem:[#allocation8 + $0xe0] sm:$0xff]  ;;  %v533_v33 = vld [vmem:[#allocation8 + $0xf0] sm:$0xff] }
  0x9e   : > { %v1189_v31 = vpack.c.bf16 %v534_v29, %v532_v28  ;;  %v536_v34 = vld [vmem:[#allocation8 + $0x108] sm:$0xff]  ;;  %v538_v35 = vld [vmem:[#allocation8 + $0x118] sm:$0xff]  ;;  %v1191_v36 = vpack.c.bf16 %v533_v33, %v531_v32  ;;  %v1838_v42 = vld [vmem:[%s1953_s4] sm:$0x3f] }
  0x9f   : > { %v1193_v37 = vpack.c.bf16 %v538_v35, %v536_v34  ;;  %v1833_v41 = vld [vmem:[%s1953_s4 + $0x8] sm:$0x3f]  ;;  %v535_v51 = vld [vmem:[#allocation8 + $0x100] sm:$0xff]  ;;  %v537_v52 = vld [vmem:[#allocation8 + $0x110] sm:$0xff] }
  0xa0   : > { %1152 = vmatpush1.bf16.msra.mxu0 %v1151_v38  ;;  %1172 = vmatpush1.bf16.msra.mxu1 %v1171_v6  ;;  %v445_v38 = vlaneseq  ;;  %v1195_v53 = vpack.c.bf16 %v537_v52, %v535_v51  ;;  %v540_v54 = vld [vmem:[#allocation8 + $0x128] sm:$0xff]  ;;  %v542_v55 = vld [vmem:[#allocation8 + $0x138] sm:$0xff]  ;;  %v539_v57 = vld [vmem:[#allocation8 + $0x120] sm:$0xff] }
  0xa1   : > { %1154 = vmatprep.subr.bf16.mxu0 %v1153_v39  ;;  %1174 = vmatprep.subr.bf16.mxu1 %v1173_v7  ;;  %v1197_v56 = vpack.c.bf16 %v542_v55, %v540_v54  ;;  %v541_v58 = vld [vmem:[#allocation8 + $0x130] sm:$0xff]  ;;  %v544_v60 = vld [vmem:[#allocation8 + $0x148] sm:$0xff]  ;;  %v546_v61 = vld [vmem:[#allocation8 + $0x158] sm:$0xff] }
  0xa2   : > { %v1827_v39 = vshrl.u32 %v445_v38, 7  ;;  %v1199_v59 = vpack.c.bf16 %v541_v58, %v539_v57  ;;  %v1201_v62 = vpack.c.bf16 %v546_v61, %v544_v60  ;;  %v543_v63 = vld [vmem:[#allocation8 + $0x140] sm:$0xff]  ;;  %v545_v1 = vld [vmem:[#allocation8 + $0x150] sm:$0xff]  ;;  %v548_v3 = vld [vmem:[#allocation8 + $0x168] sm:$0xff] }
  0xa3   : > { %v1203_v2 = vpack.c.bf16 %v545_v1, %v543_v63  ;;  %v550_v4 = vld [vmem:[#allocation8 + $0x178] sm:$0xff]  ;;  %v547_v6 = vld [vmem:[#allocation8 + $0x160] sm:$0xff]  ;;  %v549_v7 = vld [vmem:[#allocation8 + $0x170] sm:$0xff] }
  0xa4   : > { %1156 = vmatpush1.bf16.msra.mxu0 %v1155_v44  ;;  %1176 = vmatpush1.bf16.msra.mxu1 %v1175_v12  ;;  %v447_v40 = vsub.s32 0, %v1827_v39  ;;  %v1205_v5 = vpack.c.bf16 %v550_v4, %v548_v3  ;;  %v1207_v8 = vpack.c.bf16 %v549_v7, %v547_v6  ;;  %v552_v9 = vld [vmem:[#allocation8 + $0x188] sm:$0xff]  ;;  %v554_v10 = vld [vmem:[#allocation8 + $0x198] sm:$0xff]  ;;  %v551_v11 = vld [vmem:[#allocation8 + $0x180] sm:$0xff]  ;;  %v470_v54 = vsub.s32 2, %v1827_v39 }
  0xa5   : > { %1158 = vmatprep.subr.bf16.mxu0 %v1157_v45  ;;  %1178 = vmatprep.subr.bf16.mxu1 %v1177_v13  ;;  %v1209_v12 = vpack.c.bf16 %v554_v10, %v552_v9  ;;  %v553_v13 = vld [vmem:[#allocation8 + $0x190] sm:$0xff]  ;;  %v556_v14 = vld [vmem:[#allocation8 + $0x1a8] sm:$0xff]  ;;  %v558_v15 = vld [vmem:[#allocation8 + $0x1b8] sm:$0xff]  ;;  %v1568_v10 = vmov 0.0|0.0  }
  0xa6   : > { %v477_v43 = vrot.slane %v1833_v41, %v447_v40  ;;  %v448_v45 = vrot.slane %v1838_v42, %v447_v40  ;;  %v1211_v16 = vpack.c.bf16 %v553_v13, %v551_v11  ;;  %v1213_v17 = vpack.c.bf16 %v558_v15, %v556_v14  ;;  %v560_v20 = vld [vmem:[#allocation8 + $0x1c8] sm:$0xff]  ;;  %v562_v21 = vld [vmem:[#allocation8 + $0x1d8] sm:$0xff]  ;;  %v710_v7 = vld [vmem:[#allocation9 + $0x80] sm:$0xff] }
  0xa7   : > { %v1217_v23 = vpack.c.bf16 %v562_v21, %v560_v20  ;;  %v564_v26 = vld [vmem:[#allocation8 + $0x1e8] sm:$0xff]  ;;  %v566_v27 = vld [vmem:[#allocation8 + $0x1f8] sm:$0xff]  ;;  %v471_v3 = vrot.slane %v1838_v42, %v470_v54  ;;  %v712_v9 = vld [vmem:[#allocation9 + $0x90] sm:$0xff]  ;;  %v569_v13 = vsub.s32 3, %v1827_v39 }
  0xa8   : > { %1160 = vmatpush1.bf16.msra.mxu0 %v1159_v48  ;;  %1180 = vmatpush1.bf16.msra.mxu1 %v1179_v18  ;;  %v555_v18 = vld [vmem:[#allocation8 + $0x1a0] sm:$0xff]  ;;  %v1221_v29 = vpack.c.bf16 %v566_v27, %v564_v26  ;;  %v713_v11 = vld [vmem:[#allocation9 + $0x98] sm:$0xff] }
  0xa9   : > { %1182 = vmatprep.subr.bf16.mxu1 %v1181_v19  ;;  %v557_v19 = vld [vmem:[#allocation8 + $0x1b0] sm:$0xff]  ;;  %1225 = vmatprep.subr.bf16.mxu0 %v1568_v10  ;;  %v574_v14 = vrot.slane %v1833_v41, %v569_v13  ;;  %v570_v15 = vrot.slane %v1838_v42, %v569_v13  ;;  %v717_v26 = vld [vmem:[#allocation9 + $0xb8] sm:$0xff] }
  0xaa   : > { %v1215_v22 = vpack.c.bf16 %v557_v19, %v555_v18  ;;  %v700_v13 = vld [vmem:[#allocation9 + $0x30] sm:$0xff] }
  0xab   : > { %439 = vmatmul.mubr.f32.vlgmr.msra.gmra.mrb[0].mxu0 %v341_v49 }
  0xac   : > { %1184 = vmatpush1.bf16.msra.mxu1 %v1183_v24  ;;  %v559_v24 = vld [vmem:[#allocation8 + $0x1c0] sm:$0xff]  ;;  %1091 = vmatprep.mubr.msk.f32.mxu0 %vm1569_vm0, %v1567_v0 }
  0xad   : > { %1186 = vmatprep.subr.bf16.mxu1 %v1185_v25  ;;  %v561_v25 = vld [vmem:[#allocation8 + $0x1d0] sm:$0xff] }
  0xae   : > { %v1219_v28 = vpack.c.bf16 %v561_v25, %v559_v24  ;;  %v716_v25 = vld [vmem:[#allocation9 + $0xb0] sm:$0xff] }
  0xaf   : > { %v1235_v27 = vpack.c.bf16 %v717_v26, %v716_v25  ;;  %v707_v25 = vld [vmem:[#allocation9 + $0x68] sm:$0xff] }
  0xb0   : > { %1188 = vmatpush1.bf16.msra.mxu1 %v1187_v30  ;;  %v563_v30 = vld [vmem:[#allocation8 + $0x1e0] sm:$0xff] }
  0xb1   : > { %1190 = vmatprep.subr.bf16.mxu1 %v1189_v31  ;;  %v565_v31 = vld [vmem:[#allocation8 + $0x1f0] sm:$0xff] }
  0xb2   : > { %v1223_v32 = vpack.c.bf16 %v565_v31, %v563_v30  ;;  %v720_v31 = vld [vmem:[#allocation9 + $0xd0] sm:$0xff] }
  0xb4   : > { %1192 = vmatpush1.bf16.msra.mxu1 %v1191_v36 }
  0xb5   : > { %1194 = vmatprep.subr.bf16.mxu1 %v1193_v37 }
  0xb8   : > { %1196 = vmatpush1.bf16.msra.mxu1 %v1195_v53  ;;  %v465_v53 = vsub.s32 1, %v1827_v39 }
  0xb9   : > { %1198 = vmatprep.subr.bf16.mxu1 %v1197_v56 }
  0xba   : > { %v495_v56 = vrot.slane %v1833_v41, %v465_v53 }
  0xbc   : > { %1200 = vmatpush1.bf16.msra.mxu1 %v1199_v59  ;;  %v500_v59 = vrot.slane %v1833_v41, %v470_v54  ;;  %v661_v54 = vsub.s32 4, %v1827_v39 }
  0xbd   : > { %1202 = vmatprep.subr.bf16.mxu1 %v1201_v62  ;;  %v466_v62 = vrot.slane %v1838_v42, %v465_v53 }
  0xc0   : > { %1204 = vmatpush1.bf16.msra.mxu1 %v1203_v2 }
  0xc1   : > { %1206 = vmatprep.subr.bf16.mxu1 %v1205_v5 }
  0xc4   : > { %1208 = vmatpush1.bf16.msra.mxu1 %v1207_v8  ;;  %v711_v8 = vld [vmem:[#allocation9 + $0x88] sm:$0xff] }
  0xc5   : > { %1210 = vmatprep.subr.bf16.mxu1 %v1209_v12  ;;  %v1229_v12 = vpack.c.bf16 %v713_v11, %v712_v9  ;;  %v699_v11 = vld [vmem:[#allocation9 + $0x28] sm:$0xff] }
  0xc8   : > { %1212 = vmatpush1.bf16.msra.mxu1 %v1211_v16 }
  0xc9   : > { %1214 = vmatprep.subr.bf16.mxu1 %v1213_v17 }
  0xcc   : > { %1216 = vmatpush1.bf16.msra.mxu1 %v1215_v22  ;;  %v714_v22 = vld [vmem:[#allocation9 + $0xa0] sm:$0xff] }
  0xcd   : > { %1218 = vmatprep.subr.bf16.mxu1 %v1217_v23  ;;  %v715_v23 = vld [vmem:[#allocation9 + $0xa8] sm:$0xff] }
  0xce   : > { %v1232_v24 = vpack.c.bf16 %v715_v23, %v714_v22 }
  0xd0   : > { %1220 = vmatpush1.bf16.msra.mxu1 %v1219_v28  ;;  %v718_v28 = vld [vmem:[#allocation9 + $0xc0] sm:$0xff] }
  0xd1   : > { %1222 = vmatprep.subr.bf16.mxu1 %v1221_v29  ;;  %v719_v29 = vld [vmem:[#allocation9 + $0xc8] sm:$0xff] }
  0xd2   : > { %v1238_v30 = vpack.c.bf16 %v719_v29, %v718_v28  ;;  %v708_v29 = vld [vmem:[#allocation9 + $0x70] sm:$0xff] }
  0xd4   : > { %1224 = vmatpush1.bf16.msra.mxu1 %v1223_v32  ;;  %v721_v32 = vld [vmem:[#allocation9 + $0xd8] sm:$0xff] }
 0x17e   : > { %v440_v44 = vpop.f32.mrb[0].mxu0 }
 0x17f   : > { %v442_v46 = vpop.f32.mrb[1].mxu0  ;;  %v1844_v48 = vadd.f32 %v448_v45, %v440_v44 }
 0x180   : > { %v1842_v47 = vadd.f32 %v477_v43, %v442_v46 }
 0x181   : > { %v453_v50 = vmul.f32 %v1844_v48, %v1844_v48 }
 0x182   : > { %479 = vadd.xlane.f32.xlu0 %v1842_v47  ;;  %v482_v49 = vmul.f32 %v1842_v47, %v1842_v47 }
 0x184   : > { %483 = vadd.xlane.f32.xlu1 %v482_v49 }
 0x186   : > { %450 = vadd.xlane.f32.xlu0 %v1844_v48 }
 0x188   : > { %454 = vadd.xlane.f32.xlu1 %v453_v50 }
 0x20f   : > { %v480_v33 = vpop.xlane.xlu0 %479 }
 0x210   : > { %v481_v34 = vmul.f32 0.03125, %v480_v33  ;;  %v722_v33 = vld [vmem:[#allocation9 + $0xe0] sm:$0xff] }
 0x211   : > { %v484_v35 = vpop.xlane.xlu1 %483 }
 0x212   : > { %v486_v36 = vmul.f32 %v481_v34, %v481_v34  ;;  %v485_v37 = vmul.f32 0.03125, %v484_v35  ;;  %v488_v55 = vsub.f32 %v1842_v47, %v481_v34  ;;  %v1241_v34 = vpack.c.bf16 %v721_v32, %v720_v31  ;;  %v723_v35 = vld [vmem:[#allocation9 + $0xe8] sm:$0xff] }
 0x213   : > { %v451_v40 = vpop.xlane.xlu0 %450 }
 0x214   : > { %v487_v43 = vsub.f32 %v485_v37, %v486_v36  ;;  %v452_v44 = vmul.f32 0.03125, %v451_v40  ;;  %v1244_v36 = vpack.c.bf16 %v723_v35, %v722_v33  ;;  %v724_v37 = vld [vmem:[#allocation9 + $0xf0] sm:$0xff]  ;;  %v725_v40 = vld [vmem:[#allocation9 + $0xf8] sm:$0xff] }
 0x215   : > { %v455_v45 = vpop.xlane.xlu1 %454 }
 0x216   : > { %v489_v46 = vadd.f32 1e-05, %v487_v43  ;;  %v457_v49 = vmul.f32 %v452_v44, %v452_v44  ;;  %v456_v50 = vmul.f32 0.03125, %v455_v45  ;;  %v459_v60 = vsub.f32 %v1844_v48, %v452_v44 }
 0x217   : > { %v1226_v48 = vpack.c.bf16 %v711_v8, %v710_v7  ;;  %v1247_v43 = vpack.c.bf16 %v725_v40, %v724_v37  ;;  %v696_v8 = vld [vmem:[#allocation9 + $0x10] sm:$0xff] }
 0x218   : > { %1357 = vrsqrt.f32 %v489_v46  ;;  %v458_v51 = vsub.f32 %v456_v50, %v457_v49  ;;  %v1019_v40 = vld [vmem:[%s1954_s5] ss:$0 sm:$0xff] }
 0x219   : > { %1227 = vmatpush3.bf16.msra.mxu0 %v1226_v48 }
 0x21a   : > { %v460_v52 = vadd.f32 1e-05, %v458_v51  ;;  %1228 = vmatprep.subr.bf16.mxu0 %v1568_v10 }
 0x21c   : > { %1359 = vrsqrt.f32 %v460_v52 }
 0x21d   : > { %1230 = vmatpush3.bf16.msra.mxu0 %v1229_v12 }
 0x21e   : > { %1231 = vmatprep.subr.bf16.mxu0 %v1568_v10 }
 0x221   : > { %1233 = vmatpush3.bf16.msra.mxu0 %v1232_v24  ;;  %v706_v24 = vld [vmem:[#allocation9 + $0x60] sm:$0xff] }
 0x222   : > { %v1358_v57 = vpop.eup %1357  ;;  %1234 = vmatprep.subr.bf16.mxu0 %v1568_v10  ;;  %v1268_v28 = vpack.c.bf16 %v707_v25, %v706_v24 }
 0x223   : > { %v491_v58 = vmul.f32 %v1358_v57, %v488_v55  ;;  %v666_v55 = vsub.s32 5, %v1827_v39  ;;  %v697_v39 = vld [vmem:[#allocation9 + $0x18] sm:$0xff] }
 0x224   : > { %v1253_v48 = vpack.c.bf16 %v697_v39, %v696_v8 }
 0x225   : > { %v496_v61 = vmul.f32 %v495_v56, %v491_v58  ;;  %1236 = vmatpush3.bf16.msra.mxu0 %v1235_v27  ;;  %v662_v27 = vrot.slane %v1838_v42, %v661_v54  ;;  %v667_v32 = vrot.slane %v1838_v42, %v666_v55 }
 0x226   : > { %v1360_v63 = vpop.eup %1359  ;;  %1237 = vmatprep.subr.bf16.mxu0 %v1568_v10 }
 0x227   : > { %v501_v1 = vadd.f32 %v500_v59, %v496_v61  ;;  %v462_v2 = vmul.f32 %v1360_v63, %v459_v60  ;;  %v686_v59 = vrot.slane %v1833_v41, %v661_v54 }
 0x229   : > { %v502_v4 = vmax.f32 %v501_v1, 0.0  ;;  %v467_v5 = vmul.f32 %v466_v62, %v462_v2  ;;  %1239 = vmatpush3.bf16.msra.mxu0 %v1238_v30  ;;  %v691_v62 = vrot.slane %v1833_v41, %v666_v55  ;;  %v698_v41 = vld [vmem:[#allocation9 + $0x20] sm:$0xff]  ;;  %v709_v30 = vld [vmem:[#allocation9 + $0x78] sm:$0xff] }
 0x22a   : > { %1240 = vmatprep.subr.bf16.mxu0 %v1568_v10  ;;  %v1256_v12 = vpack.c.bf16 %v699_v11, %v698_v41 }
 0x22b   : > { %639 = vmatprep.mubr.f32.mxu1 %v502_v4  ;;  %v472_v47 = vadd.f32 %v471_v3, %v467_v5  ;;  %v694_v3 = vld [vmem:[#allocation9] sm:$0xff]  ;;  %v695_v4 = vld [vmem:[#allocation9 + $0x8] sm:$0xff] }
 0x22d   : > { %v473_v6 = vmax.f32 %v472_v47, 0.0  ;;  %1242 = vmatpush3.bf16.msra.mxu0 %v1241_v34 }
 0x22e   : > { %1243 = vmatprep.subr.bf16.mxu0 %v1568_v10 }
 0x22f   : > { %640 = vmatmul.mubr.f32.vlgmr.msra.gmra.mrb[0].mxu1 %v473_v6  ;;  %v1250_v6 = vpack.c.bf16 %v695_v4, %v694_v3 }
 0x231   : > { %1245 = vmatpush3.bf16.msra.mxu0 %v1244_v36 }
 0x232   : > { %1246 = vmatprep.subr.bf16.mxu0 %v1568_v10 }
 0x235   : > { %1248 = vmatpush3.bf16.msra.mxu0 %v1247_v43 }
 0x236   : > { %1249 = vmatprep.subr.bf16.mxu0 %v1568_v10 }
 0x302   : > { %v641_v16 = vpop.f32.mrb[0].mxu1 }
 0x303   : > { %v643_v17 = vpop.f32.mrb[1].mxu1  ;;  %v1866_v19 = vadd.f32 %v641_v16, %v570_v15  ;;  %v702_v16 = vld [vmem:[#allocation9 + $0x40] sm:$0xff] }
 0x304   : > { %v644_v18 = vadd.f32 %v643_v17, %v574_v14  ;;  %v701_v14 = vld [vmem:[#allocation9 + $0x38] sm:$0xff]  ;;  %v703_v17 = vld [vmem:[#allocation9 + $0x48] sm:$0xff] }
 0x305   : > { %v649_v21 = vmul.f32 %v1866_v19, %v1866_v19  ;;  %v1259_v15 = vpack.c.bf16 %v701_v14, %v700_v13 }
 0x306   : > { %670 = vadd.xlane.f32.xlu0 %v644_v18  ;;  %v673_v20 = vmul.f32 %v644_v18, %v644_v18 }
 0x308   : > { %674 = vadd.xlane.f32.xlu1 %v673_v20  ;;  %v705_v20 = vld [vmem:[#allocation9 + $0x58] sm:$0xff] }
 0x30a   : > { %646 = vadd.xlane.f32.xlu0 %v1866_v19 }
 0x30c   : > { %650 = vadd.xlane.f32.xlu1 %v649_v21 }
 0x393   : > { %v671_v44 = vpop.xlane.xlu0 %670 }
 0x394   : > { %v672_v45 = vmul.f32 0.03125, %v671_v44  ;;  %v880_v44 = vstv %s874_s23 }
 0x395   : > { %v675_v46 = vpop.xlane.xlu1 %674 }
 0x396   : > { %v677_v49 = vmul.f32 %v672_v45, %v672_v45  ;;  %v676_v50 = vmul.f32 0.03125, %v675_v46  ;;  %v679_v57 = vsub.f32 %v644_v18, %v672_v45  ;;  %v1262_v18 = vpack.c.bf16 %v703_v17, %v702_v16 }
 0x397   : > { %v647_v53 = vpop.xlane.xlu0 %646 }
 0x398   : > { %v678_v51 = vsub.f32 %v676_v50, %v677_v49  ;;  %v648_v56 = vmul.f32 0.03125, %v647_v53 }
 0x399   : > { %v651_v58 = vpop.xlane.xlu1 %650 }
 0x39a   : > { %v680_v52 = vadd.f32 1e-05, %v678_v51  ;;  %v653_v63 = vmul.f32 %v648_v56, %v648_v56  ;;  %v652_v1 = vmul.f32 0.03125, %v651_v58  ;;  %v655_v22 = vsub.f32 %v1866_v19, %v648_v56 }
 0x39b   : > { %v1271_v19 = vpack.c.bf16 %v709_v30, %v708_v29  ;;  %v876_v51 = vand.u32 127, %v445_v38 }
 0x39c   : > { %1361 = vrsqrt.f32 %v680_v52  ;;  %v654_v47 = vsub.f32 %v652_v1, %v653_v63 }
 0x39d   : > { %vm877_vm1 = vcmp.ge.s32.totalorder %v876_v51, 8  ;;  %vm878_vm2 = vcmp.lt.s32.totalorder %v876_v51, 12 }
 0x39e   : > { %v656_v9 = vadd.f32 1e-05, %v654_v47  ;;  %vm879_vm3 = vmand %vm877_vm1, %vm878_vm2 }
 0x3a0   : > { %1363 = vrsqrt.f32 %v656_v9 }
 0x3a6   : > { %v1362_v60 = vpop.eup %1361 }
 0x3a7   : > { %v682_v61 = vmul.f32 %v1362_v60, %v679_v57 }
 0x3a9   : > { %v687_v2 = vmul.f32 %v686_v59, %v682_v61 }
 0x3aa   : > { %v1364_v21 = vpop.eup %1363 }
 0x3ab   : > { %v692_v5 = vadd.f32 %v691_v62, %v687_v2  ;;  %v658_v26 = vmul.f32 %v1364_v21, %v655_v22 }
 0x3ad   : > { %v693_v7 = vmax.f32 %v692_v5, 0.0  ;;  %v663_v31 = vmul.f32 %v662_v27, %v658_v26 }
 0x3af   : > { %1092 = vmatmul.mubr.f32.vlgmr.msra.gmra.mrb[2].mxu0 %v693_v7  ;;  %v668_v33 = vadd.f32 %v667_v32, %v663_v31 }
 0x3b0   : > { %1251 = vmatpush3.bf16.msra.mxu0 %v1250_v6  ;;  %1126 = vmatprep.mubr.msk.f32.mxu0 %vm1569_vm0, %v1567_v0  ;;  %v704_v0 = vld [vmem:[#allocation9 + $0x50] sm:$0xff] }
 0x3b1   : > { %1252 = vmatprep.subr.bf16.mxu0 %v1568_v10  ;;  %v1265_v23 = vpack.c.bf16 %v705_v20, %v704_v0  ;;  %v669_v34 = vmax.f32 %v668_v33, 0.0 }
 0x3b4   : > { %1254 = vmatpush3.bf16.msra.mxu0 %v1253_v48 }
 0x3b5   : > { %1255 = vmatprep.subr.bf16.mxu0 %v1568_v10 }
 0x3b8   : > { %1257 = vmatpush3.bf16.msra.mxu0 %v1256_v12 }
 0x3b9   : > { %1258 = vmatprep.subr.bf16.mxu0 %v1568_v10 }
 0x3bc   : > { %1260 = vmatpush3.bf16.msra.mxu0 %v1259_v15 }
 0x3bd   : > { %1261 = vmatprep.subr.bf16.mxu0 %v1568_v10 }
 0x3c0   : > { %1263 = vmatpush3.bf16.msra.mxu0 %v1262_v18 }
 0x3c1   : > { %1264 = vmatprep.subr.bf16.mxu0 %v1568_v10 }
 0x3c4   : > { %1266 = vmatpush3.bf16.msra.mxu0 %v1265_v23 }
 0x3c5   : > { %1267 = vmatprep.subr.bf16.mxu0 %v1568_v10 }
 0x3c8   : > { %1269 = vmatpush3.bf16.msra.mxu0 %v1268_v28 }
 0x3c9   : > { %1270 = vmatprep.subr.bf16.mxu0 %v1568_v10 }
 0x3cc   : > { %1272 = vmatpush3.bf16.msra.mxu0 %v1271_v19 }
 0x3cf   : > { %1127 = vmatmul.mubr.f32.vlgmr.msra.gmra.mrb[4].mxu0 %v669_v34 }
 0x482   : > { %v792_v35 = vpop.f32.mrb[2].mxu0 }
 0x483   : > { %v1093_v36 = vpop.f32.mrb[3].mxu0 }
 0x4a2   : > { %v862_v37 = vpop.f32.mrb[4].mxu0 }
 0x4a3   : > { %v863_v43 = vadd.f32 %v862_v37, %v792_v35  ;;  %v1128_v42 = vpop.f32.mrb[5].mxu0 }
 0x4a5   : > { %v873_v45 = vadd.f32 %v1019_v40, %v863_v43 }
 0x4a7   : > { %v881_v46 = vmul.f32 %v880_v44, %v873_v45 }
 0x4a9   : > { %v1020_v10 = vmul.f32 -1.442695, %v881_v46 }
 0x4ab   : > { %1365 = vpow2.f32 %v1020_v10 }
 0x4b5   : > { %v1366_v49 = vpop.eup %1365 }
 0x4b6   : > { %v885_v50 = vadd.f32 1.0, %v1366_v49 }
 0x4b8   : > { %1367 = vrcp.f32 %v885_v50 }
 0x4c2   : > { %v1368_v52 = vpop.eup %1367 }
 0x4c3   : > { %v890_v53 = vsel %vm879_vm3, %v1368_v52, %v873_v45 }
 0x4c4   : > { %891 = vst [vmem:[%s338_s25] sm:$0xff] %v890_v53 }
 0x4c5   : > { %1496 = shalt.err (!%p1493_p4)
}
 0x4c6   : > { %s1497_s14 = scalar_lea.hbm %s1905_s17, 128  ;;  %s1501_s11 = scalar_lea.hbm %s1956_s7, 256 }
 0x4c7   : > { %p1498_p0 = scmp.ne.s32.totalorder %s1905_s17, %s1497_s14  ;;  %p1502_p8 = scmp.lt.u32.totalorder %s1905_s17, %s1956_s7 }
 0x4c8   : > { %p1503_p13 = scmp.lt.u32.totalorder %s1501_s11, %s1497_s14  ;;  %p1505_p10 = scmp.lt.u32.totalorder %s1497_s14, %s1905_s17 }
 0x4c9   : > { %p1499_p9 = pnand %p1498_p0, %p1759_p5 }
 0x4ca   : > { %p1504_p6 = por %p1503_p13, %p1502_p8 }
 0x4cb   : > { %p1500_p11 = pneg %p1499_p9 }
 0x4cc   : > { %p1506_p3 = por %p1505_p10, %p1504_p6 }
 0x4ce   : > { %p1507_p7 = pnand %p1506_p3, %p1500_p11 }
 0x4d0   : > { %1510 = shalt.err (!%p1507_p7)
}
 0x4d1   : > { %1287 = dma.vmem_to_hbm [thread:$0]  (%p1759_p5), %s1907_s12, 128, %s1905_s17, %s893_s8  }
 0x4d2 PF: > { %s918_s25 = sand.u32 1, %s1545_s26   ;;  %p1974_p12 = scmp.ne.s32.totalorder %s1961_s9, 0 }
 0x4d3   : > { %p1975_p2 = scmp.ge.s32.totalorder %s1557_s29, 2  ;;  %s919_s18 = scalar_lea.sflag [#allocation5], %s918_s25 }
 0x4d5   : > { %p1304_p1 = pnand %p1975_p2, %p1974_p12 }
 0x4d7   : > { %1540 = dma.done.wait (!%p1304_p1), %s919_s18, 128  }
 0x4d8   : > { %1542 = vsyncadd (!%p1304_p1), %s919_s18, 4294967168  ;;  %p23_p4 = scmp.ge.s32.totalorder %s1745_s16, 4   ;;  %s1976_s26 = smov %s1549_s27 }
 0x4d9   : > { %s1977_s27 = smov %s1553_s28  ;;  %s1978_s28 = smov %s1755_s20 }
 0x4da   : > { %s1979_s29 = smov %s1745_s16  ;;  %25 = sbr.rel (!%p23_p4) target bundleno = 9 (0x9), region = 105 }
 0x4e1   :  { %924 = vsyncpa [#allocation4], 1 }
 0x4e2   :  { %926 = vsyncpa [#allocation4 + $0x1], 1 }
 0x4e3   :  { %927 = vsyncpa [#allocation7], 1 }
 0x4e4   :  { %928 = vsyncpa [#allocation10], 1 }
 0x4e5   :  { %929 = vsyncpa [#allocation5], 1 }
 0x4e6   :  { %931 = vsyncpa [#allocation5 + $0x1], 1 }

// kernel: tpu_custom_call.1
= control target key start
LH: loop header
LB: loop body
LE: loop exit
PB: predicated region body
PF: predicated region fallthrough
CT: control target
= control target key end

     0   :  { %s1949_s0 = inlined_call_operand.hbm [shape: f32[16,128], index: 0, kind: input, shape index: {}]   ;;  %s1950_s1 = inlined_call_operand.hbm [shape: f32[128,256], index: 1, kind: input, shape index: {}]   ;;  %s1951_s2 = inlined_call_operand.hbm [shape: f32[256,256], index: 2, kind: input, shape index: {}]   ;;  %s1952_s3 = inlined_call_operand.hbm [shape: f32[256,128], index: 3, kind: input, shape index: {}]   ;;  %s1953_s4 = inlined_call_operand.vmem [shape: f32[6,256], index: 4, kind: input, shape index: {}]   ;;  %s1954_s5 = inlined_call_operand.vmem [shape: f32[1,128], index: 5, kind: input, shape index: {}]   ;;  %s1955_s6 = inlined_call_operand.<no memory space> [shape: f32[1,1], index: 6, kind: input, shape index: {}]   ;;  %s1956_s7 = inlined_call_operand.hbm [shape: f32[16,128], index: 7, kind: output, shape index: {}]  }
   0x1   :  { %12 = sst [smem:[#allocation2]] %s1955_s6 }
   0x2   :  { %13 = vsyncpa [#allocation4], 0 }
   0x3   :  { %15 = vsyncpa [#allocation4 + $0x1], 0 }
   0x4   :  { %16 = vsyncpa [#allocation7], 0 }
   0x5   :  { %17 = vsyncpa [#allocation10], 0 }
   0x6   :  { %18 = vsyncpa [#allocation5], 0 }
   0x7   :  { %20 = vsyncpa [#allocation5 + $0x1], 0  ;;  %s1614_s26 = smov 0   ;;  %s1616_s27 = smov 0  }
   0x8   :  { %s1618_s28 = smov 0   ;;  %s1620_s29 = smov 0  }
   0x9 LB: > { %s1635_s6 = sadd.s32 4294967295, %s1557_s29   ;;  %s1005_s30 = sadd.s32 4294967294, %s1557_s29   ;;  %s1557_s29 = sphi %s1620_s29, %s1979_s29   ;;  %s1553_s28 = sphi %s1618_s28, %s1978_s28   ;;  %s1549_s27 = sphi %s1616_s27, %s1977_s27   ;;  %s1545_s26 = sphi %s1614_s26, %s1976_s26  }
   0xa   : > { %p46_p0 = scmp.ne.s32.totalorder %s1549_s27, %s1545_s26  ;;  %p1957_p1 = scmp.eq.s32.totalorder %s1635_s6, 0 }
   0xb   : > { %p202_p3 = scmp.eq.s32.totalorder %s1005_s30, 1  ;;  %p1006_p5 = scmp.ge.s32.totalorder %s1557_s29, 1 }
   0xc   : > { %p1644_p4 = por %p1957_p1, %p46_p0  ;;  %p209_p7 = scmp.lt.s32.totalorder %s1557_s29, 3 }
   0xd   : > { %p1649_p6 = por %p202_p3, %p46_p0  ;;  %s1559_s11 = smov [#allocation6]  }
   0xe   : > { %s1960_s8 = scalar_select %p1644_p4, 1, 0 }
   0xf   : > { %s1961_s9 = scalar_select %p1649_p6, 1, 0 }
  0x10   : > { %p1654_p8 = pnand %p1006_p5, %p209_p7  ;;  %s221_s12 = sshll.u32 %s1559_s11, 4  ;;  %s1658_s12 = int_to_ptr.vmem [resolvable:$true] %s221_s12 }
  0x11   : > { %s1560_s14 = smov [#allocation8]   ;;  %s1561_s16 = smov [#allocation9]  }
  0x12   : > { %s1962_s10 = scalar_select %p1654_p8, 1, 0 }
  0x13   : > { %p1289_p9 = pneg %p1654_p8  ;;  %s234_s15 = sshll.u32 %s1560_s14, 4  ;;  %s1669_s15 = int_to_ptr.vmem [resolvable:$true] %s234_s15 }
  0x14   : > { %s1671_s17 = sshll.u32 %s1561_s16, 4  ;;  %s1369_s20 = scalar_lea.hbm %s1950_s1, 4096  ;;  %s248_s17 = int_to_ptr.vmem [resolvable:$true] %s1671_s17 }
  0x15   : > { %p1665_p11 = pnand %p1289_p9, %p1957_p1  ;;  %p1370_p12 = scmp.ne.s32.totalorder %s1950_s1, %s1369_s20 }
  0x16   : > { %p1376_p5 = scmp.lt.u32.totalorder %s1369_s20, %s1950_s1 }
  0x17   : > { %p1681_p13 = pneg %p1665_p11 }
  0x19   : > { %p1372_p0 = pnand %p1681_p13, %p1370_p12 }
  0x1b   : > { %p1373_p3 = pneg %p1372_p0 }
  0x1d   : > { %p1378_p7 = pnand %p1376_p5, %p1373_p3 }
  0x1f   : > { %1381 = shalt.err (!%p1378_p7)
}
  0x20   : > { %s1382_s30 = scalar_lea.vmem %s1658_s12, 4096  ;;  %p1390_p2 = scmp.lt.s32.totalorder %s1658_s12, %s1658_s12 }
  0x21   : > { %p1383_p9 = scmp.ne.s32.totalorder %s1658_s12, %s1382_s30  ;;  %p1391_p6 = scmp.lt.s32.totalorder %s1382_s30, %s1382_s30 }
  0x23   : > { %p1385_p10 = pnand %p1383_p9, %p1681_p13  ;;  %p1392_p12 = por %p1391_p6, %p1390_p2 }
  0x25   : > { %p1386_p1 = pneg %p1385_p10 }
  0x27   : > { %p1393_p0 = pnand %p1392_p12, %p1386_p1 }
  0x29   : > { %1396 = shalt.err (!%p1393_p0)
}
  0x2a   : > { %s1562_s11 = smov 256   ;;  %s1563_s14 = smov 16  }
  0x2b   : > { %1292 = dma.hbm_to_vmem [thread:$0]  (!%p1665_p11), %s1950_s1, 4096, %s1658_s12, [#allocation7], %s1562_s11, %s1562_s11, %s1563_s14  }
  0x2c   : > { %s1397_s21 = scalar_lea.hbm %s1951_s2, 8192 }
  0x2d   : > { %p1398_p2 = scmp.ne.s32.totalorder %s1951_s2, %s1397_s21  ;;  %p1404_p10 = scmp.lt.u32.totalorder %s1397_s21, %s1951_s2 }
  0x2f   : > { %p1400_p1 = pnand %p1398_p2, %p1681_p13 }
  0x31   : > { %p1401_p6 = pneg %p1400_p1 }
  0x33   : > { %p1406_p3 = pnand %p1404_p10, %p1401_p6 }
  0x35   : > { %1409 = shalt.err (!%p1406_p3)
}
  0x36   : > { %s1410_s12 = scalar_lea.vmem %s1669_s15, 8192  ;;  %p1418_p12 = scmp.lt.s32.totalorder %s1669_s15, %s1669_s15 }
  0x37   : > { %p1411_p5 = scmp.ne.s32.totalorder %s1669_s15, %s1410_s12  ;;  %p1419_p0 = scmp.lt.s32.totalorder %s1410_s12, %s1410_s12 }
  0x39   : > { %p1413_p7 = pnand %p1411_p5, %p1681_p13  ;;  %p1420_p2 = por %p1419_p0, %p1418_p12 }
  0x3b   : > { %p1414_p9 = pneg %p1413_p7 }
  0x3d   : > { %p1421_p1 = pnand %p1420_p2, %p1414_p9 }
  0x3f   : > { %1424 = shalt.err (!%p1421_p1)
}
  0x40   : > { %1295 = dma.hbm_to_vmem [thread:$0]  (!%p1665_p11), %s1951_s2, 8192, %s1669_s15, [#allocation7], %s1562_s11, %s1562_s11, %s1563_s14  }
  0x41   : > { %s1425_s21 = scalar_lea.hbm %s1952_s3, 4096 }
  0x42   : > { %p1426_p6 = scmp.ne.s32.totalorder %s1952_s3, %s1425_s21  ;;  %p1432_p5 = scmp.lt.u32.totalorder %s1425_s21, %s1952_s3 }
  0x44   : > { %p1428_p10 = pnand %p1426_p6, %p1681_p13 }
  0x46   : > { %p1429_p3 = pneg %p1428_p10 }
  0x48   : > { %p1434_p7 = pnand %p1432_p5, %p1429_p3 }
  0x4a   : > { %1437 = shalt.err (!%p1434_p7)
}
  0x4b   : > { %s1438_s12 = scalar_lea.vmem %s248_s17, 4096  ;;  %p1446_p2 = scmp.lt.s32.totalorder %s248_s17, %s248_s17 }
  0x4c   : > { %p1439_p9 = scmp.ne.s32.totalorder %s248_s17, %s1438_s12  ;;  %p1447_p1 = scmp.lt.s32.totalorder %s1438_s12, %s1438_s12 }
  0x4e   : > { %p1441_p12 = pnand %p1439_p9, %p1681_p13  ;;  %p1448_p4 = por %p1447_p1, %p1446_p2 }
  0x50   : > { %p1442_p0 = pneg %p1441_p12 }
  0x52   : > { %p1449_p8 = pnand %p1448_p4, %p1442_p0 }
  0x54   : > { %1452 = shalt.err (!%p1449_p8)
}
  0x55   : > { %s1564_s15 = smov 128   ;;  %s1565_s23 = smov 8  }
  0x56   : > { %1298 = dma.hbm_to_vmem [thread:$0]  (!%p1665_p11), %s1952_s3, 4096, %s248_s17, [#allocation10], %s1564_s15, %s1564_s15, %s1565_s23  }
  0x57   : > { %s1745_s16 = sadd.s32 1, %s1557_s29   ;;  %s33_s19 = sadd.s32 1, %s1553_s28 }
  0x58   : > { %s30_s18 = ssub.s32 %s1557_s29, %s1745_s16  ;;  %p40_p8 = scmp.ne.s32.totalorder %s1553_s28, %s1549_s27 }
  0x59   : > { %p31_p4 = scmp.eq.s32.totalorder %s30_s18, 0  ;;  %p41_p13 = scmp.eq.s32.totalorder %s1557_s29, 0 }
  0x5a   : > { %p1310_p6 = scmp.lt.s32.totalorder %s1557_s29, 2  ;;  %p1965_p3 = scmp.eq.s32.totalorder %s1635_s6, 1 }
  0x5b   : > { %s1755_s20 = scalar_select %p31_p4, %s1553_s28, %s33_s19  }
  0x5c   : > { %p42_p10 = por %p41_p13, %p40_p8  ;;  %p1759_p5 = por %p1965_p3, %p40_p8 }
  0x5d   : > { %s270_s13 = sand.u32 1, %s1553_s28   ;;  %s1012_s22 = sshll.u32 %s1557_s29, 7 }
  0x5e   : > { %s1011_s17 = sshll.u32 %s270_s13, 3  ;;  %s1768_s30 = scalar_lea.hbm %s1949_s0, %s1012_s22 }
  0x5f   : > { %s274_s12 = scalar_lea.vmem [#allocation3], %s1011_s17  ;;  %p1770_p11 = pnand %p1310_p6, %p42_p10 }
  0x60   : > { %s281_s15 = sshll.u32 %s274_s12, 4  ;;  %s271_s11 = scalar_lea.sflag [#allocation4], %s270_s13  ;;  %s1774_s15 = int_to_ptr.vmem [resolvable:$true] %s281_s15 }
  0x61   : > { %s1453_s14 = scalar_lea.hbm %s1768_s30, 128  ;;  %p1455_p9 = pneg %p1770_p11 }
  0x62   : > { %p1454_p7 = scmp.ne.s32.totalorder %s1768_s30, %s1453_s14  ;;  %s1458_s22 = scalar_lea.hbm %s1949_s0, 256 }
  0x63   : > { %p1459_p2 = scmp.lt.u32.totalorder %s1768_s30, %s1949_s0  ;;  %p1460_p1 = scmp.lt.u32.totalorder %s1458_s22, %s1453_s14 }
  0x64   : > { %p1456_p12 = pnand %p1455_p9, %p1454_p7  ;;  %p1462_p8 = scmp.lt.u32.totalorder %s1453_s14, %s1768_s30 }
  0x65   : > { %p1461_p4 = por %p1460_p1, %p1459_p2 }
  0x66   : > { %p1457_p0 = pneg %p1456_p12 }
  0x67   : > { %p1463_p13 = por %p1462_p8, %p1461_p4 }
  0x69   : > { %p1464_p6 = pnand %p1463_p13, %p1457_p0 }
  0x6b   : > { %1467 = shalt.err (!%p1464_p6)
}
  0x6c   : > { %s1468_s13 = scalar_lea.vmem %s1774_s15, 128  ;;  %s1566_s25 = smov [#allocation3]  }
  0x6d   : > { %p1469_p10 = scmp.ne.s32.totalorder %s1774_s15, %s1468_s13  ;;  %s1473_s12 = sshll.u32 %s1566_s25, 4  ;;  %s1474_s12 = int_to_ptr.vmem [resolvable:$false] %s1473_s12 }
  0x6e   : > { %s1475_s18 = scalar_lea.vmem %s1474_s12, 256  ;;  %p1476_p12 = scmp.lt.s32.totalorder %s1774_s15, %s1474_s12 }
  0x6f   : > { %p1471_p3 = pnand %p1469_p10, %p1455_p9  ;;  %p1477_p2 = scmp.lt.s32.totalorder %s1475_s18, %s1468_s13 }
  0x71   : > { %p1472_p7 = pneg %p1471_p3  ;;  %p1478_p1 = por %p1477_p2, %p1476_p12 }
  0x73   : > { %p1479_p4 = pnand %p1478_p1, %p1472_p7 }
  0x75   : > { %1482 = shalt.err (!%p1479_p4)
}
  0x76   : > { %1302 = dma.hbm_to_vmem [thread:$0]  (!%p1770_p11), %s1768_s30, 128, %s1774_s15, %s271_s11  }
  0x77   : > { %p1968_p0 = scmp.ne.s32.totalorder %s1962_s10, 0 }
  0x78   : > { %s1804_s14 = sand.u32 (!%p1968_p0), 1, %s1549_s27   ;;  %p1969_p9 = scmp.ne.s32.totalorder (!%p1968_p0), %s1960_s8, 0 }
  0x79   : > { %290 = sbr.rel (%p1968_p0) target bundleno = 1234 (0x4d2), region = 48  ;;  %s1014_s19 = sshll.u32 (!%p1968_p0), %s1804_s14, 3 }
  0x7a   : > { %s293_s22 = scalar_lea.sflag (!%p1968_p0), [#allocation4], %s1804_s14  ;;  %s1810_s17 = scalar_lea.vmem (!%p1968_p0), [#allocation3], %s1014_s19 }
  0x80   : > { %1528 = dma.done.wait (%p1969_p9), %s293_s22, 128  }
  0x81   : > { %1530 = vsyncadd (%p1969_p9), %s293_s22, 4294967168  ;;  %p1970_p11 = scmp.eq.s32.totalorder %s1635_s6, 0 }
  0x83   : > { %1532 = dma.done.wait (%p1970_p11), [#allocation7], 12288   ;;  %p1971_p8 = pmov %p1970_p11 }
  0x85   : > { %1534 = vsyncadd (%p1971_p8), [#allocation7], 4294955008  ;;  %p1972_p13 = pmov %p1971_p8 }
  0x86   : > { %p1973_p6 = pmov %p1971_p8 }
  0x87   : > { %1536 = dma.done.wait (%p1972_p13), [#allocation10], 4096  }
  0x88   : > { %1538 = vsyncadd (%p1973_p6), [#allocation10], 4294963200  ;;  %v1567_v0 = vmov 0.0   ;;  %v343_v1 = vld [vmem:[#allocation6 + $0x8] sm:$0xff]  ;;  %v345_v2 = vld [vmem:[#allocation6 + $0x18] sm:$0xff]  ;;  %vm1569_vm0 = vmmov 0  }
  0x89   : > { %438 = vmatprep.mubr.f32.mxu0 %v1567_v0  ;;  %v342_v3 = vld [vmem:[#allocation6] sm:$0xff]  ;;  %v1129_v4 = vpack.c.bf16 %v345_v2, %v343_v1  ;;  %v344_v5 = vld [vmem:[#allocation6 + $0x10] sm:$0xff]  ;;  %v347_v6 = vld [vmem:[#allocation6 + $0x28] sm:$0xff]  ;;  %s874_s23 = sld [smem:[#allocation2]]  ;;  %s1022_s13 = sshll.u32 %s1635_s6, 7 }
  0x8a   : > { %v349_v7 = vld [vmem:[#allocation6 + $0x38] sm:$0xff]  ;;  %v1131_v8 = vpack.c.bf16 %v344_v5, %v342_v3  ;;  %v346_v10 = vld [vmem:[#allocation6 + $0x20] sm:$0xff]  ;;  %v348_v11 = vld [vmem:[#allocation6 + $0x30] sm:$0xff]  ;;  %s338_s25 = scalar_lea.vmem [#allocation11], %s1014_s19  ;;  %s893_s8 = scalar_lea.sflag [#allocation5], %s1804_s14 }
  0x8b   : > { %v1133_v9 = vpack.c.bf16 %v349_v7, %v347_v6  ;;  %v351_v12 = vld [vmem:[#allocation6 + $0x48] sm:$0xff]  ;;  %1130 = vmatprep.subr.bf16.mxu0 %v1129_v4  ;;  %v353_v13 = vld [vmem:[#allocation6 + $0x58] sm:$0xff]  ;;  %v1135_v14 = vpack.c.bf16 %v348_v11, %v346_v10  ;;  %v350_v16 = vld [vmem:[#allocation6 + $0x40] sm:$0xff]  ;;  %s906_s12 = sshll.u32 %s338_s25, 4  ;;  %s1570_s6 = smov [#allocation11]   ;;  %s1907_s12 = int_to_ptr.vmem [resolvable:$true] %s906_s12 }
  0x8c   : > { %1132 = vmatpush1.bf16.msra.mxu0 %v1131_v8  ;;  %v1137_v15 = vpack.c.bf16 %v353_v13, %v351_v12  ;;  %v352_v17 = vld [vmem:[#allocation6 + $0x50] sm:$0xff]  ;;  %v355_v18 = vld [vmem:[#allocation6 + $0x68] sm:$0xff]  ;;  %v357_v19 = vld [vmem:[#allocation6 + $0x78] sm:$0xff]  ;;  %s1483_s10 = scalar_lea.vmem %s1907_s12, 128  ;;  %s1487_s19 = sshll.u32 %s1570_s6, 4  ;;  %s1488_s19 = int_to_ptr.vmem [resolvable:$false] %s1487_s19 }
  0x8d   : > { %1134 = vmatprep.subr.bf16.mxu0 %v1133_v9  ;;  %v1139_v20 = vpack.c.bf16 %v352_v17, %v350_v16  ;;  %v1141_v21 = vpack.c.bf16 %v357_v19, %v355_v18  ;;  %v354_v22 = vld [vmem:[#allocation6 + $0x60] sm:$0xff]  ;;  %v356_v23 = vld [vmem:[#allocation6 + $0x70] sm:$0xff]  ;;  %v359_v24 = vld [vmem:[#allocation6 + $0x88] sm:$0xff]  ;;  %p1484_p10 = scmp.ne.s32.totalorder %s1907_s12, %s1483_s10  ;;  %s1489_s30 = scalar_lea.vmem %s1488_s19, 256 }
  0x8e   : > { %v361_v25 = vld [vmem:[#allocation6 + $0x98] sm:$0xff]  ;;  %v1143_v26 = vpack.c.bf16 %v356_v23, %v354_v22  ;;  %v358_v28 = vld [vmem:[#allocation6 + $0x80] sm:$0xff]  ;;  %v360_v29 = vld [vmem:[#allocation6 + $0x90] sm:$0xff]  ;;  %p1490_p12 = scmp.lt.s32.totalorder %s1907_s12, %s1488_s19  ;;  %p1491_p2 = scmp.lt.s32.totalorder %s1489_s30, %s1483_s10 }
  0x8f   : > { %v1145_v27 = vpack.c.bf16 %v361_v25, %v359_v24  ;;  %v363_v30 = vld [vmem:[#allocation6 + $0xa8] sm:$0xff]  ;;  %v365_v31 = vld [vmem:[#allocation6 + $0xb8] sm:$0xff]  ;;  %v1147_v32 = vpack.c.bf16 %v360_v29, %v358_v28  ;;  %v362_v34 = vld [vmem:[#allocation6 + $0xa0] sm:$0xff]  ;;  %p1485_p3 = pnand %p1484_p10, %p1759_p5 }
  0x90   : > { %1136 = vmatpush1.bf16.msra.mxu0 %v1135_v14  ;;  %v1149_v33 = vpack.c.bf16 %v365_v31, %v363_v30  ;;  %v364_v35 = vld [vmem:[#allocation6 + $0xb0] sm:$0xff]  ;;  %v367_v36 = vld [vmem:[#allocation6 + $0xc8] sm:$0xff]  ;;  %v369_v37 = vld [vmem:[#allocation6 + $0xd8] sm:$0xff]  ;;  %p1492_p1 = por %p1491_p2, %p1490_p12 }
  0x91   : > { %1138 = vmatprep.subr.bf16.mxu0 %v1137_v15  ;;  %v1151_v38 = vpack.c.bf16 %v364_v35, %v362_v34  ;;  %v1153_v39 = vpack.c.bf16 %v369_v37, %v367_v36  ;;  %v366_v40 = vld [vmem:[#allocation6 + $0xc0] sm:$0xff]  ;;  %v368_v41 = vld [vmem:[#allocation6 + $0xd0] sm:$0xff]  ;;  %v371_v42 = vld [vmem:[#allocation6 + $0xe8] sm:$0xff]  ;;  %p1486_p7 = pneg %p1485_p3 }
  0x92   : > { %v373_v43 = vld [vmem:[#allocation6 + $0xf8] sm:$0xff]  ;;  %v1155_v44 = vpack.c.bf16 %v368_v41, %v366_v40  ;;  %v370_v46 = vld [vmem:[#allocation6 + $0xe0] sm:$0xff]  ;;  %v372_v47 = vld [vmem:[#allocation6 + $0xf0] sm:$0xff] }
  0x93   : > { %v1157_v45 = vpack.c.bf16 %v373_v43, %v371_v42  ;;  %v1159_v48 = vpack.c.bf16 %v372_v47, %v370_v46  ;;  %v341_v49 = vld [vmem:[%s1810_s17] sm:$0xff]  ;;  %v504_v50 = vld [vmem:[#allocation8 + $0x8] sm:$0xff]  ;;  %v503_v52 = vld [vmem:[#allocation8] sm:$0xff]  ;;  %s1905_s17 = scalar_lea.hbm %s1956_s7, %s1022_s13  ;;  %p1493_p4 = pnand %p1492_p1, %p1486_p7 }
  0x94   : > { %1140 = vmatpush1.bf16.msra.mxu0 %v1139_v20  ;;  %v506_v51 = vld [vmem:[#allocation8 + $0x18] sm:$0xff]  ;;  %v505_v54 = vld [vmem:[#allocation8 + $0x10] sm:$0xff]  ;;  %v508_v55 = vld [vmem:[#allocation8 + $0x28] sm:$0xff] }
  0x95   : > { %1142 = vmatprep.subr.bf16.mxu0 %v1141_v21  ;;  %v1161_v53 = vpack.c.bf16 %v506_v51, %v504_v50  ;;  %v510_v56 = vld [vmem:[#allocation8 + $0x38] sm:$0xff]  ;;  %v1163_v57 = vpack.c.bf16 %v505_v54, %v503_v52  ;;  %v507_v59 = vld [vmem:[#allocation8 + $0x20] sm:$0xff]  ;;  %v509_v60 = vld [vmem:[#allocation8 + $0x30] sm:$0xff] }
  0x96   : > { %v1165_v58 = vpack.c.bf16 %v510_v56, %v508_v55  ;;  %v512_v61 = vld [vmem:[#allocation8 + $0x48] sm:$0xff]  ;;  %v514_v62 = vld [vmem:[#allocation8 + $0x58] sm:$0xff]  ;;  %v1167_v63 = vpack.c.bf16 %v509_v60, %v507_v59  ;;  %v511_v2 = vld [vmem:[#allocation8 + $0x40] sm:$0xff] }
  0x97   : > { %1162 = vmatprep.subr.bf16.mxu1 %v1161_v53  ;;  %v1169_v1 = vpack.c.bf16 %v514_v62, %v512_v61  ;;  %v513_v3 = vld [vmem:[#allocation8 + $0x50] sm:$0xff]  ;;  %v516_v4 = vld [vmem:[#allocation8 + $0x68] sm:$0xff]  ;;  %v518_v5 = vld [vmem:[#allocation8 + $0x78] sm:$0xff] }
  0x98   : > { %1144 = vmatpush1.bf16.msra.mxu0 %v1143_v26  ;;  %1164 = vmatpush1.bf16.msra.mxu1 %v1163_v57  ;;  %v1171_v6 = vpack.c.bf16 %v513_v3, %v511_v2  ;;  %v1173_v7 = vpack.c.bf16 %v518_v5, %v516_v4  ;;  %v515_v8 = vld [vmem:[#allocation8 + $0x60] sm:$0xff]  ;;  %v517_v9 = vld [vmem:[#allocation8 + $0x70] sm:$0xff]  ;;  %v520_v10 = vld [vmem:[#allocation8 + $0x88] sm:$0xff] }
  0x99   : > { %1146 = vmatprep.subr.bf16.mxu0 %v1145_v27  ;;  %1166 = vmatprep.subr.bf16.mxu1 %v1165_v58  ;;  %v522_v11 = vld [vmem:[#allocation8 + $0x98] sm:$0xff]  ;;  %v1175_v12 = vpack.c.bf16 %v517_v9, %v515_v8  ;;  %v519_v14 = vld [vmem:[#allocation8 + $0x80] sm:$0xff]  ;;  %v521_v15 = vld [vmem:[#allocation8 + $0x90] sm:$0xff] }
  0x9a   : > { %v1177_v13 = vpack.c.bf16 %v522_v11, %v520_v10  ;;  %v524_v16 = vld [vmem:[#allocation8 + $0xa8] sm:$0xff]  ;;  %v526_v17 = vld [vmem:[#allocation8 + $0xb8] sm:$0xff]  ;;  %v1179_v18 = vpack.c.bf16 %v521_v15, %v519_v14  ;;  %v523_v20 = vld [vmem:[#allocation8 + $0xa0] sm:$0xff] }
  0x9b   : > { %v1181_v19 = vpack.c.bf16 %v526_v17, %v524_v16  ;;  %v525_v21 = vld [vmem:[#allocation8 + $0xb0] sm:$0xff]  ;;  %v528_v22 = vld [vmem:[#allocation8 + $0xc8] sm:$0xff]  ;;  %v530_v23 = vld [vmem:[#allocation8 + $0xd8] sm:$0xff] }
  0x9c   : > { %1148 = vmatpush1.bf16.msra.mxu0 %v1147_v32  ;;  %1168 = vmatpush1.bf16.msra.mxu1 %v1167_v63  ;;  %v1183_v24 = vpack.c.bf16 %v525_v21, %v523_v20  ;;  %v1185_v25 = vpack.c.bf16 %v530_v23, %v528_v22  ;;  %v527_v26 = vld [vmem:[#allocation8 + $0xc0] sm:$0xff]  ;;  %v529_v27 = vld [vmem:[#allocation8 + $0xd0] sm:$0xff]  ;;  %v532_v28 = vld [vmem:[#allocation8 + $0xe8] sm:$0xff] }
  0x9d   : > { %1150 = vmatprep.subr.bf16.mxu0 %v1149_v33  ;;  %1170 = vmatprep.subr.bf16.mxu1 %v1169_v1  ;;  %v534_v29 = vld [vmem:[#allocation8 + $0xf8] sm:$0xff]  ;;  %v1187_v30 = vpack.c.bf16 %v529_v27, %v527_v26  ;;  %v531_v32 = vld [vmem:[#allocation8 + $0xe0] sm:$0xff]  ;;  %v533_v33 = vld [vmem:[#allocation8 + $0xf0] sm:$0xff] }
  0x9e   : > { %v1189_v31 = vpack.c.bf16 %v534_v29, %v532_v28  ;;  %v536_v34 = vld [vmem:[#allocation8 + $0x108] sm:$0xff]  ;;  %v538_v35 = vld [vmem:[#allocation8 + $0x118] sm:$0xff]  ;;  %v1191_v36 = vpack.c.bf16 %v533_v33, %v531_v32  ;;  %v1838_v42 = vld [vmem:[%s1953_s4] sm:$0x3f] }
  0x9f   : > { %v1193_v37 = vpack.c.bf16 %v538_v35, %v536_v34  ;;  %v1833_v41 = vld [vmem:[%s1953_s4 + $0x8] sm:$0x3f]  ;;  %v535_v51 = vld [vmem:[#allocation8 + $0x100] sm:$0xff]  ;;  %v537_v52 = vld [vmem:[#allocation8 + $0x110] sm:$0xff] }
  0xa0   : > { %1152 = vmatpush1.bf16.msra.mxu0 %v1151_v38  ;;  %1172 = vmatpush1.bf16.msra.mxu1 %v1171_v6  ;;  %v445_v38 = vlaneseq  ;;  %v1195_v53 = vpack.c.bf16 %v537_v52, %v535_v51  ;;  %v540_v54 = vld [vmem:[#allocation8 + $0x128] sm:$0xff]  ;;  %v542_v55 = vld [vmem:[#allocation8 + $0x138] sm:$0xff]  ;;  %v539_v57 = vld [vmem:[#allocation8 + $0x120] sm:$0xff] }
  0xa1   : > { %1154 = vmatprep.subr.bf16.mxu0 %v1153_v39  ;;  %1174 = vmatprep.subr.bf16.mxu1 %v1173_v7  ;;  %v1197_v56 = vpack.c.bf16 %v542_v55, %v540_v54  ;;  %v541_v58 = vld [vmem:[#allocation8 + $0x130] sm:$0xff]  ;;  %v544_v60 = vld [vmem:[#allocation8 + $0x148] sm:$0xff]  ;;  %v546_v61 = vld [vmem:[#allocation8 + $0x158] sm:$0xff] }
  0xa2   : > { %v1827_v39 = vshrl.u32 %v445_v38, 7  ;;  %v1199_v59 = vpack.c.bf16 %v541_v58, %v539_v57  ;;  %v1201_v62 = vpack.c.bf16 %v546_v61, %v544_v60  ;;  %v543_v63 = vld [vmem:[#allocation8 + $0x140] sm:$0xff]  ;;  %v545_v1 = vld [vmem:[#allocation8 + $0x150] sm:$0xff]  ;;  %v548_v3 = vld [vmem:[#allocation8 + $0x168] sm:$0xff] }
  0xa3   : > { %v1203_v2 = vpack.c.bf16 %v545_v1, %v543_v63  ;;  %v550_v4 = vld [vmem:[#allocation8 + $0x178] sm:$0xff]  ;;  %v547_v6 = vld [vmem:[#allocation8 + $0x160] sm:$0xff]  ;;  %v549_v7 = vld [vmem:[#allocation8 + $0x170] sm:$0xff] }
  0xa4   : > { %1156 = vmatpush1.bf16.msra.mxu0 %v1155_v44  ;;  %1176 = vmatpush1.bf16.msra.mxu1 %v1175_v12  ;;  %v447_v40 = vsub.s32 0, %v1827_v39  ;;  %v1205_v5 = vpack.c.bf16 %v550_v4, %v548_v3  ;;  %v1207_v8 = vpack.c.bf16 %v549_v7, %v547_v6  ;;  %v552_v9 = vld [vmem:[#allocation8 + $0x188] sm:$0xff]  ;;  %v554_v10 = vld [vmem:[#allocation8 + $0x198] sm:$0xff]  ;;  %v551_v11 = vld [vmem:[#allocation8 + $0x180] sm:$0xff]  ;;  %v470_v54 = vsub.s32 2, %v1827_v39 }
  0xa5   : > { %1158 = vmatprep.subr.bf16.mxu0 %v1157_v45  ;;  %1178 = vmatprep.subr.bf16.mxu1 %v1177_v13  ;;  %v1209_v12 = vpack.c.bf16 %v554_v10, %v552_v9  ;;  %v553_v13 = vld [vmem:[#allocation8 + $0x190] sm:$0xff]  ;;  %v556_v14 = vld [vmem:[#allocation8 + $0x1a8] sm:$0xff]  ;;  %v558_v15 = vld [vmem:[#allocation8 + $0x1b8] sm:$0xff]  ;;  %v1568_v10 = vmov 0.0|0.0  }
  0xa6   : > { %v477_v43 = vrot.slane %v1833_v41, %v447_v40  ;;  %v448_v45 = vrot.slane %v1838_v42, %v447_v40  ;;  %v1211_v16 = vpack.c.bf16 %v553_v13, %v551_v11  ;;  %v1213_v17 = vpack.c.bf16 %v558_v15, %v556_v14  ;;  %v560_v20 = vld [vmem:[#allocation8 + $0x1c8] sm:$0xff]  ;;  %v562_v21 = vld [vmem:[#allocation8 + $0x1d8] sm:$0xff]  ;;  %v710_v7 = vld [vmem:[#allocation9 + $0x80] sm:$0xff] }
  0xa7   : > { %v1217_v23 = vpack.c.bf16 %v562_v21, %v560_v20  ;;  %v564_v26 = vld [vmem:[#allocation8 + $0x1e8] sm:$0xff]  ;;  %v566_v27 = vld [vmem:[#allocation8 + $0x1f8] sm:$0xff]  ;;  %v471_v3 = vrot.slane %v1838_v42, %v470_v54  ;;  %v712_v9 = vld [vmem:[#allocation9 + $0x90] sm:$0xff]  ;;  %v569_v13 = vsub.s32 3, %v1827_v39 }
  0xa8   : > { %1160 = vmatpush1.bf16.msra.mxu0 %v1159_v48  ;;  %1180 = vmatpush1.bf16.msra.mxu1 %v1179_v18  ;;  %v555_v18 = vld [vmem:[#allocation8 + $0x1a0] sm:$0xff]  ;;  %v1221_v29 = vpack.c.bf16 %v566_v27, %v564_v26  ;;  %v713_v11 = vld [vmem:[#allocation9 + $0x98] sm:$0xff] }
  0xa9   : > { %1182 = vmatprep.subr.bf16.mxu1 %v1181_v19  ;;  %v557_v19 = vld [vmem:[#allocation8 + $0x1b0] sm:$0xff]  ;;  %1225 = vmatprep.subr.bf16.mxu0 %v1568_v10  ;;  %v574_v14 = vrot.slane %v1833_v41, %v569_v13  ;;  %v570_v15 = vrot.slane %v1838_v42, %v569_v13  ;;  %v717_v26 = vld [vmem:[#allocation9 + $0xb8] sm:$0xff] }
  0xaa   : > { %v1215_v22 = vpack.c.bf16 %v557_v19, %v555_v18  ;;  %v700_v13 = vld [vmem:[#allocation9 + $0x30] sm:$0xff] }
  0xab   : > { %439 = vmatmul.mubr.f32.vlgmr.msra.gmra.mrb[0].mxu0 %v341_v49 }
  0xac   : > { %1184 = vmatpush1.bf16.msra.mxu1 %v1183_v24  ;;  %v559_v24 = vld [vmem:[#allocation8 + $0x1c0] sm:$0xff]  ;;  %1091 = vmatprep.mubr.msk.f32.mxu0 %vm1569_vm0, %v1567_v0 }
  0xad   : > { %1186 = vmatprep.subr.bf16.mxu1 %v1185_v25  ;;  %v561_v25 = vld [vmem:[#allocation8 + $0x1d0] sm:$0xff] }
  0xae   : > { %v1219_v28 = vpack.c.bf16 %v561_v25, %v559_v24  ;;  %v716_v25 = vld [vmem:[#allocation9 + $0xb0] sm:$0xff] }
  0xaf   : > { %v1235_v27 = vpack.c.bf16 %v717_v26, %v716_v25  ;;  %v707_v25 = vld [vmem:[#allocation9 + $0x68] sm:$0xff] }
  0xb0   : > { %1188 = vmatpush1.bf16.msra.mxu1 %v1187_v30  ;;  %v563_v30 = vld [vmem:[#allocation8 + $0x1e0] sm:$0xff] }
  0xb1   : > { %1190 = vmatprep.subr.bf16.mxu1 %v1189_v31  ;;  %v565_v31 = vld [vmem:[#allocation8 + $0x1f0] sm:$0xff] }
  0xb2   : > { %v1223_v32 = vpack.c.bf16 %v565_v31, %v563_v30  ;;  %v720_v31 = vld [vmem:[#allocation9 + $0xd0] sm:$0xff] }
  0xb4   : > { %1192 = vmatpush1.bf16.msra.mxu1 %v1191_v36 }
  0xb5   : > { %1194 = vmatprep.subr.bf16.mxu1 %v1193_v37 }
  0xb8   : > { %1196 = vmatpush1.bf16.msra.mxu1 %v1195_v53  ;;  %v465_v53 = vsub.s32 1, %v1827_v39 }
  0xb9   : > { %1198 = vmatprep.subr.bf16.mxu1 %v1197_v56 }
  0xba   : > { %v495_v56 = vrot.slane %v1833_v41, %v465_v53 }
  0xbc   : > { %1200 = vmatpush1.bf16.msra.mxu1 %v1199_v59  ;;  %v500_v59 = vrot.slane %v1833_v41, %v470_v54  ;;  %v661_v54 = vsub.s32 4, %v1827_v39 }
  0xbd   : > { %1202 = vmatprep.subr.bf16.mxu1 %v1201_v62  ;;  %v466_v62 = vrot.slane %v1838_v42, %v465_v53 }
  0xc0   : > { %1204 = vmatpush1.bf16.msra.mxu1 %v1203_v2 }
  0xc1   : > { %1206 = vmatprep.subr.bf16.mxu1 %v1205_v5 }
  0xc4   : > { %1208 = vmatpush1.bf16.msra.mxu1 %v1207_v8  ;;  %v711_v8 = vld [vmem:[#allocation9 + $0x88] sm:$0xff] }
  0xc5   : > { %1210 = vmatprep.subr.bf16.mxu1 %v1209_v12  ;;  %v1229_v12 = vpack.c.bf16 %v713_v11, %v712_v9  ;;  %v699_v11 = vld [vmem:[#allocation9 + $0x28] sm:$0xff] }
  0xc8   : > { %1212 = vmatpush1.bf16.msra.mxu1 %v1211_v16 }
  0xc9   : > { %1214 = vmatprep.subr.bf16.mxu1 %v1213_v17 }
  0xcc   : > { %1216 = vmatpush1.bf16.msra.mxu1 %v1215_v22  ;;  %v714_v22 = vld [vmem:[#allocation9 + $0xa0] sm:$0xff] }
  0xcd   : > { %1218 = vmatprep.subr.bf16.mxu1 %v1217_v23  ;;  %v715_v23 = vld [vmem:[#allocation9 + $0xa8] sm:$0xff] }
  0xce   : > { %v1232_v24 = vpack.c.bf16 %v715_v23, %v714_v22 }
  0xd0   : > { %1220 = vmatpush1.bf16.msra.mxu1 %v1219_v28  ;;  %v718_v28 = vld [vmem:[#allocation9 + $0xc0] sm:$0xff] }
  0xd1   : > { %1222 = vmatprep.subr.bf16.mxu1 %v1221_v29  ;;  %v719_v29 = vld [vmem:[#allocation9 + $0xc8] sm:$0xff] }
  0xd2   : > { %v1238_v30 = vpack.c.bf16 %v719_v29, %v718_v28  ;;  %v708_v29 = vld [vmem:[#allocation9 + $0x70] sm:$0xff] }
  0xd4   : > { %1224 = vmatpush1.bf16.msra.mxu1 %v1223_v32  ;;  %v721_v32 = vld [vmem:[#allocation9 + $0xd8] sm:$0xff] }
 0x17e   : > { %v440_v44 = vpop.f32.mrb[0].mxu0 }
 0x17f   : > { %v442_v46 = vpop.f32.mrb[1].mxu0  ;;  %v1844_v48 = vadd.f32 %v448_v45, %v440_v44 }
 0x180   : > { %v1842_v47 = vadd.f32 %v477_v43, %v442_v46 }
 0x181   : > { %v453_v50 = vmul.f32 %v1844_v48, %v1844_v48 }
 0x182   : > { %479 = vadd.xlane.f32.xlu0 %v1842_v47  ;;  %v482_v49 = vmul.f32 %v1842_v47, %v1842_v47 }
 0x184   : > { %483 = vadd.xlane.f32.xlu1 %v482_v49 }
 0x186   : > { %450 = vadd.xlane.f32.xlu0 %v1844_v48 }
 0x188   : > { %454 = vadd.xlane.f32.xlu1 %v453_v50 }
 0x20f   : > { %v480_v33 = vpop.xlane.xlu0 %479 }
 0x210   : > { %v481_v34 = vmul.f32 0.03125, %v480_v33  ;;  %v722_v33 = vld [vmem:[#allocation9 + $0xe0] sm:$0xff] }
 0x211   : > { %v484_v35 = vpop.xlane.xlu1 %483 }
 0x212   : > { %v486_v36 = vmul.f32 %v481_v34, %v481_v34  ;;  %v485_v37 = vmul.f32 0.03125, %v484_v35  ;;  %v488_v55 = vsub.f32 %v1842_v47, %v481_v34  ;;  %v1241_v34 = vpack.c.bf16 %v721_v32, %v720_v31  ;;  %v723_v35 = vld [vmem:[#allocation9 + $0xe8] sm:$0xff] }
 0x213   : > { %v451_v40 = vpop.xlane.xlu0 %450 }
 0x214   : > { %v487_v43 = vsub.f32 %v485_v37, %v486_v36  ;;  %v452_v44 = vmul.f32 0.03125, %v451_v40  ;;  %v1244_v36 = vpack.c.bf16 %v723_v35, %v722_v33  ;;  %v724_v37 = vld [vmem:[#allocation9 + $0xf0] sm:$0xff]  ;;  %v725_v40 = vld [vmem:[#allocation9 + $0xf8] sm:$0xff] }
 0x215   : > { %v455_v45 = vpop.xlane.xlu1 %454 }
 0x216   : > { %v489_v46 = vadd.f32 1e-05, %v487_v43  ;;  %v457_v49 = vmul.f32 %v452_v44, %v452_v44  ;;  %v456_v50 = vmul.f32 0.03125, %v455_v45  ;;  %v459_v60 = vsub.f32 %v1844_v48, %v452_v44 }
 0x217   : > { %v1226_v48 = vpack.c.bf16 %v711_v8, %v710_v7  ;;  %v1247_v43 = vpack.c.bf16 %v725_v40, %v724_v37  ;;  %v696_v8 = vld [vmem:[#allocation9 + $0x10] sm:$0xff] }
 0x218   : > { %1357 = vrsqrt.f32 %v489_v46  ;;  %v458_v51 = vsub.f32 %v456_v50, %v457_v49  ;;  %v1019_v40 = vld [vmem:[%s1954_s5] ss:$0 sm:$0xff] }
 0x219   : > { %1227 = vmatpush3.bf16.msra.mxu0 %v1226_v48 }
 0x21a   : > { %v460_v52 = vadd.f32 1e-05, %v458_v51  ;;  %1228 = vmatprep.subr.bf16.mxu0 %v1568_v10 }
 0x21c   : > { %1359 = vrsqrt.f32 %v460_v52 }
 0x21d   : > { %1230 = vmatpush3.bf16.msra.mxu0 %v1229_v12 }
 0x21e   : > { %1231 = vmatprep.subr.bf16.mxu0 %v1568_v10 }
 0x221   : > { %1233 = vmatpush3.bf16.msra.mxu0 %v1232_v24  ;;  %v706_v24 = vld [vmem:[#allocation9 + $0x60] sm:$0xff] }
 0x222   : > { %v1358_v57 = vpop.eup %1357  ;;  %1234 = vmatprep.subr.bf16.mxu0 %v1568_v10  ;;  %v1268_v28 = vpack.c.bf16 %v707_v25, %v706_v24 }
 0x223   : > { %v491_v58 = vmul.f32 %v1358_v57, %v488_v55  ;;  %v666_v55 = vsub.s32 5, %v1827_v39  ;;  %v697_v39 = vld [vmem:[#allocation9 + $0x18] sm:$0xff] }
 0x224   : > { %v1253_v48 = vpack.c.bf16 %v697_v39, %v696_v8 }
 0x225   : > { %v496_v61 = vmul.f32 %v495_v56, %v491_v58  ;;  %1236 = vmatpush3.bf16.msra.mxu0 %v1235_v27  ;;  %v662_v27 = vrot.slane %v1838_v42, %v661_v54  ;;  %v667_v32 = vrot.slane %v1838_v42, %v666_v55 }
 0x226   : > { %v1360_v63 = vpop.eup %1359  ;;  %1237 = vmatprep.subr.bf16.mxu0 %v1568_v10 }
 0x227   : > { %v501_v1 = vadd.f32 %v500_v59, %v496_v61  ;;  %v462_v2 = vmul.f32 %v1360_v63, %v459_v60  ;;  %v686_v59 = vrot.slane %v1833_v41, %v661_v54 }
 0x229   : > { %v502_v4 = vmax.f32 %v501_v1, 0.0  ;;  %v467_v5 = vmul.f32 %v466_v62, %v462_v2  ;;  %1239 = vmatpush3.bf16.msra.mxu0 %v1238_v30  ;;  %v691_v62 = vrot.slane %v1833_v41, %v666_v55  ;;  %v698_v41 = vld [vmem:[#allocation9 + $0x20] sm:$0xff]  ;;  %v709_v30 = vld [vmem:[#allocation9 + $0x78] sm:$0xff] }
 0x22a   : > { %1240 = vmatprep.subr.bf16.mxu0 %v1568_v10  ;;  %v1256_v12 = vpack.c.bf16 %v699_v11, %v698_v41 }
 0x22b   : > { %639 = vmatprep.mubr.f32.mxu1 %v502_v4  ;;  %v472_v47 = vadd.f32 %v471_v3, %v467_v5  ;;  %v694_v3 = vld [vmem:[#allocation9] sm:$0xff]  ;;  %v695_v4 = vld [vmem:[#allocation9 + $0x8] sm:$0xff] }
 0x22d   : > { %v473_v6 = vmax.f32 %v472_v47, 0.0  ;;  %1242 = vmatpush3.bf16.msra.mxu0 %v1241_v34 }
 0x22e   : > { %1243 = vmatprep.subr.bf16.mxu0 %v1568_v10 }
 0x22f   : > { %640 = vmatmul.mubr.f32.vlgmr.msra.gmra.mrb[0].mxu1 %v473_v6  ;;  %v1250_v6 = vpack.c.bf16 %v695_v4, %v694_v3 }
 0x231   : > { %1245 = vmatpush3.bf16.msra.mxu0 %v1244_v36 }
 0x232   : > { %1246 = vmatprep.subr.bf16.mxu0 %v1568_v10 }
 0x235   : > { %1248 = vmatpush3.bf16.msra.mxu0 %v1247_v43 }
 0x236   : > { %1249 = vmatprep.subr.bf16.mxu0 %v1568_v10 }
 0x302   : > { %v641_v16 = vpop.f32.mrb[0].mxu1 }
 0x303   : > { %v643_v17 = vpop.f32.mrb[1].mxu1  ;;  %v1866_v19 = vadd.f32 %v641_v16, %v570_v15  ;;  %v702_v16 = vld [vmem:[#allocation9 + $0x40] sm:$0xff] }
 0x304   : > { %v644_v18 = vadd.f32 %v643_v17, %v574_v14  ;;  %v701_v14 = vld [vmem:[#allocation9 + $0x38] sm:$0xff]  ;;  %v703_v17 = vld [vmem:[#allocation9 + $0x48] sm:$0xff] }
 0x305   : > { %v649_v21 = vmul.f32 %v1866_v19, %v1866_v19  ;;  %v1259_v15 = vpack.c.bf16 %v701_v14, %v700_v13 }
 0x306   : > { %670 = vadd.xlane.f32.xlu0 %v644_v18  ;;  %v673_v20 = vmul.f32 %v644_v18, %v644_v18 }
 0x308   : > { %674 = vadd.xlane.f32.xlu1 %v673_v20  ;;  %v705_v20 = vld [vmem:[#allocation9 + $0x58] sm:$0xff] }
 0x30a   : > { %646 = vadd.xlane.f32.xlu0 %v1866_v19 }
 0x30c   : > { %650 = vadd.xlane.f32.xlu1 %v649_v21 }
 0x393   : > { %v671_v44 = vpop.xlane.xlu0 %670 }
 0x394   : > { %v672_v45 = vmul.f32 0.03125, %v671_v44  ;;  %v880_v44 = vstv %s874_s23 }
 0x395   : > { %v675_v46 = vpop.xlane.xlu1 %674 }
 0x396   : > { %v677_v49 = vmul.f32 %v672_v45, %v672_v45  ;;  %v676_v50 = vmul.f32 0.03125, %v675_v46  ;;  %v679_v57 = vsub.f32 %v644_v18, %v672_v45  ;;  %v1262_v18 = vpack.c.bf16 %v703_v17, %v702_v16 }
 0x397   : > { %v647_v53 = vpop.xlane.xlu0 %646 }
 0x398   : > { %v678_v51 = vsub.f32 %v676_v50, %v677_v49  ;;  %v648_v56 = vmul.f32 0.03125, %v647_v53 }
 0x399   : > { %v651_v58 = vpop.xlane.xlu1 %650 }
 0x39a   : > { %v680_v52 = vadd.f32 1e-05, %v678_v51  ;;  %v653_v63 = vmul.f32 %v648_v56, %v648_v56  ;;  %v652_v1 = vmul.f32 0.03125, %v651_v58  ;;  %v655_v22 = vsub.f32 %v1866_v19, %v648_v56 }
 0x39b   : > { %v1271_v19 = vpack.c.bf16 %v709_v30, %v708_v29  ;;  %v876_v51 = vand.u32 127, %v445_v38 }
 0x39c   : > { %1361 = vrsqrt.f32 %v680_v52  ;;  %v654_v47 = vsub.f32 %v652_v1, %v653_v63 }
 0x39d   : > { %vm877_vm1 = vcmp.ge.s32.totalorder %v876_v51, 8  ;;  %vm878_vm2 = vcmp.lt.s32.totalorder %v876_v51, 12 }
 0x39e   : > { %v656_v9 = vadd.f32 1e-05, %v654_v47  ;;  %vm879_vm3 = vmand %vm877_vm1, %vm878_vm2 }
 0x3a0   : > { %1363 = vrsqrt.f32 %v656_v9 }
 0x3a6   : > { %v1362_v60 = vpop.eup %1361 }
 0x3a7   : > { %v682_v61 = vmul.f32 %v1362_v60, %v679_v57 }
 0x3a9   : > { %v687_v2 = vmul.f32 %v686_v59, %v682_v61 }
 0x3aa   : > { %v1364_v21 = vpop.eup %1363 }
 0x3ab   : > { %v692_v5 = vadd.f32 %v691_v62, %v687_v2  ;;  %v658_v26 = vmul.f32 %v1364_v21, %v655_v22 }
 0x3ad   : > { %v693_v7 = vmax.f32 %v692_v5, 0.0  ;;  %v663_v31 = vmul.f32 %v662_v27, %v658_v26 }
 0x3af   : > { %1092 = vmatmul.mubr.f32.vlgmr.msra.gmra.mrb[2].mxu0 %v693_v7  ;;  %v668_v33 = vadd.f32 %v667_v32, %v663_v31 }
 0x3b0   : > { %1251 = vmatpush3.bf16.msra.mxu0 %v1250_v6  ;;  %1126 = vmatprep.mubr.msk.f32.mxu0 %vm1569_vm0, %v1567_v0  ;;  %v704_v0 = vld [vmem:[#allocation9 + $0x50] sm:$0xff] }
 0x3b1   : > { %1252 = vmatprep.subr.bf16.mxu0 %v1568_v10  ;;  %v1265_v23 = vpack.c.bf16 %v705_v20, %v704_v0  ;;  %v669_v34 = vmax.f32 %v668_v33, 0.0 }
 0x3b4   : > { %1254 = vmatpush3.bf16.msra.mxu0 %v1253_v48 }
 0x3b5   : > { %1255 = vmatprep.subr.bf16.mxu0 %v1568_v10 }
 0x3b8   : > { %1257 = vmatpush3.bf16.msra.mxu0 %v1256_v12 }
 0x3b9   : > { %1258 = vmatprep.subr.bf16.mxu0 %v1568_v10 }
 0x3bc   : > { %1260 = vmatpush3.bf16.msra.mxu0 %v1259_v15 }
 0x3bd   : > { %1261 = vmatprep.subr.bf16.mxu0 %v1568_v10 }
 0x3c0   : > { %1263 = vmatpush3.bf16.msra.mxu0 %v1262_v18 }
 0x3c1   : > { %1264 = vmatprep.subr.bf16.mxu0 %v1568_v10 }
 0x3c4   : > { %1266 = vmatpush3.bf16.msra.mxu0 %v1265_v23 }
 0x3c5   : > { %1267 = vmatprep.subr.bf16.mxu0 %v1568_v10 }
 0x3c8   : > { %1269 = vmatpush3.bf16.msra.mxu0 %v1268_v28 }
 0x3c9   : > { %1270 = vmatprep.subr.bf16.mxu0 %v1568_v10 }
 0x3cc   : > { %1272 = vmatpush3.bf16.msra.mxu0 %v1271_v19 }
 0x3cf   : > { %1127 = vmatmul.mubr.f32.vlgmr.msra.gmra.mrb[4].mxu0 %v669_v34 }
 0x482   : > { %v792_v35 = vpop.f32.mrb[2].mxu0 }
 0x483   : > { %v1093_v36 = vpop.f32.mrb[3].mxu0 }
 0x4a2   : > { %v862_v37 = vpop.f32.mrb[4].mxu0 }
 0x4a3   : > { %v863_v43 = vadd.f32 %v862_v37, %v792_v35  ;;  %v1128_v42 = vpop.f32.mrb[5].mxu0 }
 0x4a5   : > { %v873_v45 = vadd.f32 %v1019_v40, %v863_v43 }
 0x4a7   : > { %v881_v46 = vmul.f32 %v880_v44, %v873_v45 }
 0x4a9   : > { %v1020_v10 = vmul.f32 -1.442695, %v881_v46 }
 0x4ab   : > { %1365 = vpow2.f32 %v1020_v10 }
 0x4b5   : > { %v1366_v49 = vpop.eup %1365 }
 0x4b6   : > { %v885_v50 = vadd.f32 1.0, %v1366_v49 }
 0x4b8   : > { %1367 = vrcp.f32 %v885_v50 }
 0x4c2   : > { %v1368_v52 = vpop.eup %1367 }
 0x4c3   : > { %v890_v53 = vsel %vm879_vm3, %v1368_v52, %v873_v45 }
 0x4c4   : > { %891 = vst [vmem:[%s338_s25] sm:$0xff] %v890_v53 }
 0x4c5   : > { %1496 = shalt.err (!%p1493_p4)
}
 0x4c6   : > { %s1497_s14 = scalar_lea.hbm %s1905_s17, 128  ;;  %s1501_s11 = scalar_lea.hbm %s1956_s7, 256 }
 0x4c7   : > { %p1498_p0 = scmp.ne.s32.totalorder %s1905_s17, %s1497_s14  ;;  %p1502_p8 = scmp.lt.u32.totalorder %s1905_s17, %s1956_s7 }
 0x4c8   : > { %p1503_p13 = scmp.lt.u32.totalorder %s1501_s11, %s1497_s14  ;;  %p1505_p10 = scmp.lt.u32.totalorder %s1497_s14, %s1905_s17 }
 0x4c9   : > { %p1499_p9 = pnand %p1498_p0, %p1759_p5 }
 0x4ca   : > { %p1504_p6 = por %p1503_p13, %p1502_p8 }
 0x4cb   : > { %p1500_p11 = pneg %p1499_p9 }
 0x4cc   : > { %p1506_p3 = por %p1505_p10, %p1504_p6 }
 0x4ce   : > { %p1507_p7 = pnand %p1506_p3, %p1500_p11 }
 0x4d0   : > { %1510 = shalt.err (!%p1507_p7)
}
 0x4d1   : > { %1287 = dma.vmem_to_hbm [thread:$0]  (%p1759_p5), %s1907_s12, 128, %s1905_s17, %s893_s8  }
 0x4d2 PF: > { %s918_s25 = sand.u32 1, %s1545_s26   ;;  %p1974_p12 = scmp.ne.s32.totalorder %s1961_s9, 0 }
 0x4d3   : > { %p1975_p2 = scmp.ge.s32.totalorder %s1557_s29, 2  ;;  %s919_s18 = scalar_lea.sflag [#allocation5], %s918_s25 }
 0x4d5   : > { %p1304_p1 = pnand %p1975_p2, %p1974_p12 }
 0x4d7   : > { %1540 = dma.done.wait (!%p1304_p1), %s919_s18, 128  }
 0x4d8   : > { %1542 = vsyncadd (!%p1304_p1), %s919_s18, 4294967168  ;;  %p23_p4 = scmp.ge.s32.totalorder %s1745_s16, 4   ;;  %s1976_s26 = smov %s1549_s27 }
 0x4d9   : > { %s1977_s27 = smov %s1553_s28  ;;  %s1978_s28 = smov %s1755_s20 }
 0x4da   : > { %s1979_s29 = smov %s1745_s16  ;;  %25 = sbr.rel (!%p23_p4) target bundleno = 9 (0x9), region = 105 }
 0x4e1   :  { %924 = vsyncpa [#allocation4], 1 }
 0x4e2   :  { %926 = vsyncpa [#allocation4 + $0x1], 1 }
 0x4e3   :  { %927 = vsyncpa [#allocation7], 1 }
 0x4e4   :  { %928 = vsyncpa [#allocation10], 1 }
 0x4e5   :  { %929 = vsyncpa [#allocation5], 1 }
 0x4e6   :  { %931 = vsyncpa [#allocation5 + $0x1], 1 }

</bundles_post_ra>
